<compile_context>
chip_gen: v6e
topology: v6e:2x2x1
jax: 0.10.0
libtpu: 0.0.40
codegen_flags: <defaults>
</compile_context>

<pallas_src>
import functools
import math

import jax
import jax.numpy as jnp
import numpy as np
from jax.experimental import pallas as pl
from jax.experimental.pallas import tpu as pltpu


# ----------------------------- Pallas kernel --------------------------------
def _tess_group_kernel(
    x_ref,                                              # (1, S, H)   f32
    wq_ref, bq_ref, wk_ref, bk_ref, wv_ref, bv_ref,     # (nh,H,d) bf16 / (nh,1,d) f32
    wo_ref, bo_ref,                                     # (nh,d,H) bf16 / (1,H) f32
    ln1g_ref, ln1b_ref,                                 # (1,H) f32
    wf1_ref, bf1_ref, wf2_ref, bf2_ref,                 # (1,H,I) bf16 / (1,1,I) f32 / (1,I,H) bf16 / (1,1,H) f32
    ln2g_ref, ln2b_ref,                                 # (1,1,H) f32
    out_ref,                                            # (1, S, H)
    hid_ref,                                            # VMEM scratch (S, H) f32
    *, num_heads, head_dim, eps,
):
    f32 = jnp.float32
    cdt = jnp.bfloat16        # MXU operand dtype (2x throughput, half the DMA bytes)

    layer = pl.program_id(1)
    n_layers = pl.num_programs(1)

    # First layer of this batch element: load hidden state from HBM input.
    @pl.when(layer == 0)
    def _():
        hid_ref[...] = x_ref[0].astype(f32)

    x = hid_ref[...]                                    # (S, H) f32
    S, H = x.shape

    # ---- batched per-head Q/K/V projections (leading batch = heads) ----
    xb = jnp.broadcast_to(x.astype(cdt), (num_heads, S, H))          # (nh, S, H) bf16
    qh = jnp.einsum("hsk,hkd->hsd", xb, wq_ref[...],
                    preferred_element_type=f32) + bq_ref[...]        # (nh, S, d)
    kh = jnp.einsum("hsk,hkd->hsd", xb, wk_ref[...],
                    preferred_element_type=f32) + bk_ref[...]
    vh = jnp.einsum("hsk,hkd->hsd", xb, wv_ref[...],
                    preferred_element_type=f32) + bv_ref[...]

    # ---- scaled dot-product attention, batched over heads ----
    scale = 1.0 / math.sqrt(head_dim)
    scores = jnp.einsum("hsd,htd->hst", qh.astype(cdt), kh.astype(cdt),
                        preferred_element_type=f32) * scale          # (nh, S, S)
    m = jnp.max(scores, axis=-1, keepdims=True)
    p = jnp.exp(scores - m)
    denom = jnp.sum(p, axis=-1, keepdims=True)
    p = p * pl.reciprocal(denom, approx=True)                        # EUP, not VALU divide

    ctx = jnp.einsum("hst,htd->hsd", p.astype(cdt), vh.astype(cdt),
                     preferred_element_type=f32)                     # (nh, S, d)

    # ---- output projection (per-head matmul, summed over heads) + residual + LN ----
    proj = jnp.sum(
        jnp.einsum("hsd,hdo->hso", ctx.astype(cdt), wo_ref[...],
                   preferred_element_type=f32),
        axis=0) + bo_ref[...]                                        # (S, H)
    res1 = x + proj
    mu1 = jnp.mean(res1, axis=-1, keepdims=True)
    var1 = jnp.mean((res1 - mu1) ** 2, axis=-1, keepdims=True)
    ln1 = (res1 - mu1) * jax.lax.rsqrt(var1 + eps) * ln1g_ref[...] + ln1b_ref[...]

    # ---- FFN: Linear -> gelu_new (tanh approx) -> Linear ----
    h1 = jnp.dot(ln1.astype(cdt), wf1_ref[0], preferred_element_type=f32) + bf1_ref[0]
    g = 0.5 * h1 * (1.0 + jnp.tanh(0.7978845608028654 * (h1 + 0.044715 * h1 * h1 * h1)))
    h2 = jnp.dot(g.astype(cdt), wf2_ref[0], preferred_element_type=f32) + bf2_ref[0]

    # ---- full-layer residual + LayerNorm ----
    res2 = h2 + ln1
    mu2 = jnp.mean(res2, axis=-1, keepdims=True)
    var2 = jnp.mean((res2 - mu2) ** 2, axis=-1, keepdims=True)
    ln2 = (res2 - mu2) * jax.lax.rsqrt(var2 + eps) * ln2g_ref[0] + ln2b_ref[0]

    hid_ref[...] = ln2                     # carry to the next layer (stays in VMEM)

    @pl.when(layer == n_layers - 1)
    def _():
        out_ref[0] = ln2.astype(out_ref.dtype)


# ------------------------------- wrapper -------------------------------------
def tess_layer_group(x, attn_params, ffn_params_list, *, num_heads, eps,
                     compute_dtype=jnp.bfloat16):
    """TESSLayerGroup.forward fused into a single pallas_call. x: (B, S, H) f32."""
    B, S, H = x.shape
    assert H % num_heads == 0, "hidden size must be divisible by num_attention_heads"
    head_dim = H // num_heads
    L = len(ffn_params_list)
    I = ffn_params_list[0]["wf1"].shape[1]
    f32 = jnp.float32

    # Host-side repacking: per-head attention weight layouts (bf16) and FFN params
    # stacked along a leading "layer" axis (indexed by the grid's layer axis).
    def qkv_w(w):   # (H, H) -> (nh, H, d)
        return jnp.transpose(jnp.reshape(w, (H, num_heads, head_dim)), (1, 0, 2)
                             ).astype(compute_dtype)

    def qkv_b(b):   # (1, H) -> (nh, 1, d)
        return jnp.reshape(b, (num_heads, head_dim))[:, None, :].astype(f32)

    wq3, wk3, wv3 = (qkv_w(attn_params[k]) for k in ("wq", "wk", "wv"))
    bq3, bk3, bv3 = (qkv_b(attn_params[k]) for k in ("bq", "bk", "bv"))
    wo3 = jnp.reshape(attn_params["wo"], (num_heads, head_dim, H)).astype(compute_dtype)
    bo = jnp.reshape(attn_params["bo"], (1, H)).astype(f32)
    ln1g = jnp.reshape(attn_params["ln_g"], (1, H)).astype(f32)
    ln1b = jnp.reshape(attn_params["ln_b"], (1, H)).astype(f32)

    wf1 = jnp.stack([fp["wf1"] for fp in ffn_params_list]).astype(compute_dtype)          # (L,H,I)
    bf1 = jnp.stack([jnp.reshape(fp["bf1"], (1, I)) for fp in ffn_params_list]).astype(f32)  # (L,1,I)
    wf2 = jnp.stack([fp["wf2"] for fp in ffn_params_list]).astype(compute_dtype)          # (L,I,H)
    bf2 = jnp.stack([jnp.reshape(fp["bf2"], (1, H)) for fp in ffn_params_list]).astype(f32)
    ln2g = jnp.stack([jnp.reshape(fp["ln_g"], (1, H)) for fp in ffn_params_list]).astype(f32)
    ln2b = jnp.stack([jnp.reshape(fp["ln_b"], (1, H)) for fp in ffn_params_list]).astype(f32)

    def shared(shape):      # constant block index -> DMA'd once, resident in VMEM
        return pl.BlockSpec(shape, lambda b, l, _n=len(shape): (0,) * _n)

    def per_layer(shape):   # leading "layer" axis selected by grid axis 1
        return pl.BlockSpec((1,) + tuple(shape[1:]), lambda b, l: (l, 0, 0))

    in_specs = [
        pl.BlockSpec((1, S, H), lambda b, l: (b, 0, 0)),            # x
        shared(wq3.shape), shared(bq3.shape),
        shared(wk3.shape), shared(bk3.shape),
        shared(wv3.shape), shared(bv3.shape),
        shared(wo3.shape), shared(bo.shape),
        shared(ln1g.shape), shared(ln1b.shape),
        per_layer(wf1.shape), per_layer(bf1.shape),
        per_layer(wf2.shape), per_layer(bf2.shape),
        per_layer(ln2g.shape), per_layer(ln2b.shape),
    ]

    params = (wq3, bq3, wk3, bk3, wv3, bv3, wo3, bo, ln1g, ln1b,
              wf1, bf1, wf2, bf2, ln2g, ln2b)

    # Advisory cost estimate for XLA scheduling around the custom call.
    flops_layer = (3 * 2 * S * H * H          # QKV projections
                   + 2 * 2 * S * S * H        # scores + context
                   + 2 * S * H * H            # attention output projection
                   + 2 * 2 * S * H * I)       # FFN
    flops = int(B * L * flops_layer)
    transcendentals = int(B * L * (num_heads * S * S + S * I))
    bytes_accessed = int(2 * x.size * 4 + sum(int(p.size) * p.dtype.itemsize for p in params))

    kernel = functools.partial(_tess_group_kernel, num_heads=num_heads,
                               head_dim=head_dim, eps=eps)

    return pl.pallas_call(
        kernel,
        out_shape=jax.ShapeDtypeStruct((B, S, H), x.dtype),
        grid_spec=pltpu.PrefetchScalarGridSpec(
            num_scalar_prefetch=0,
            grid=(B, L),
            in_specs=in_specs,
            out_specs=pl.BlockSpec((1, S, H), lambda b, l: (b, 0, 0)),
            scratch_shapes=[pltpu.VMEM((S, H), jnp.float32)],       # hidden carried across layers
        ),
        compiler_params=pltpu.CompilerParams(
            dimension_semantics=("parallel", "arbitrary"),
            vmem_limit_bytes=48 * 1024 * 1024,
        ),
        cost_estimate=pl.CostEstimate(flops=flops, transcendentals=transcendentals,
                                      bytes_accessed=bytes_accessed),
    )(x, *params)


# --------------------------- pure-JAX reference -------------------------------
def _ref_layer(x, ap, fp, num_heads, eps):
    B, S, H = x.shape
    d = H // num_heads
    q = x @ ap["wq"] + ap["bq"]
    k = x @ ap["wk"] + ap["bk"]
    v = x @ ap["wv"] + ap["bv"]

    def split(t):  # (B,S,H) -> (B,nh,S,d)
        return t.reshape(B, S, num_heads, d).transpose(0, 2, 1, 3)

    qh, kh, vh = split(q), split(k), split(v)
    scores = jnp.einsum("bhsd,bhtd->bhst", qh, kh) / math.sqrt(d)
    p = jax.nn.softmax(scores, axis=-1)
    ctx = jnp.einsum("bhst,bhtd->bhsd", p, vh).transpose(0, 2, 1, 3).reshape(B, S, H)
    proj = ctx @ ap["wo"] + ap["bo"]

    def ln(t, g, b):
        mu = jnp.mean(t, -1, keepdims=True)
        var = jnp.mean((t - mu) ** 2, -1, keepdims=True)
        return (t - mu) * jax.lax.rsqrt(var + eps) * g + b

    a = ln(x + proj, ap["ln_g"], ap["ln_b"])
    h1 = a @ fp["wf1"] + fp["bf1"]
    g = 0.5 * h1 * (1.0 + jnp.tanh(0.7978845608028654 * (h1 + 0.044715 * h1 ** 3)))
    h2 = g @ fp["wf2"] + fp["bf2"]
    return ln(h2 + a, fp["ln_g"], fp["ln_b"])


def ref_layer_group(x, ap, fps, num_heads, eps):
    h = x
    for fp in fps:
        h = _ref_layer(h, ap, fp, num_heads, eps)
    return h


# --------------------------------- main ---------------------------------------
if __name__ == "__main__":
    # Small ALBERT-style config: hidden=32, heads=4, intermediate=64,
    # num_hidden_layers=2, num_hidden_groups=1 -> 2 FFN layers sharing one attention.
    B, S, H = 2, 8, 32
    NUM_HEADS = 4
    INTER = 64
    NUM_FFN_LAYERS = 2          # num_hidden_layers // num_hidden_groups
    EPS = 1e-12
    # hidden_act='gelu_new', position_embedding_type='absolute',
    # attention_mask=None, head_mask[layer]=None, dropout in eval mode.

    key = jax.random.PRNGKey(0)
    keys = jax.random.split(key, 32)
    ki = iter(keys)
    std = 0.02

    def lin(kin, kout, kkey):
        return jax.random.normal(kkey, (kin, kout), jnp.float32) * std

    attn_params = {
        "wq": lin(H, H, next(ki)), "bq": jnp.zeros((1, H), jnp.float32),
        "wk": lin(H, H, next(ki)), "bk": jnp.zeros((1, H), jnp.float32),
        "wv": lin(H, H, next(ki)), "bv": jnp.zeros((1, H), jnp.float32),
        "wo": lin(H, H, next(ki)), "bo": jnp.zeros((1, H), jnp.float32),
        "ln_g": jnp.ones((1, H), jnp.float32), "ln_b": jnp.zeros((1, H), jnp.float32),
    }
    ffn_params_list = []
    for _ in range(NUM_FFN_LAYERS):
        ffn_params_list.append({
            "wf1": lin(H, INTER, next(ki)), "bf1": jnp.zeros((1, INTER), jnp.float32),
            "wf2": lin(INTER, H, next(ki)), "bf2": jnp.zeros((1, H), jnp.float32),
            "ln_g": jnp.ones((1, H), jnp.float32), "ln_b": jnp.zeros((1, H), jnp.float32),
        })

    x = jax.random.normal(next(ki), (B, S, H), jnp.float32)

    out = tess_layer_group(x, attn_params, ffn_params_list,
                           num_heads=NUM_HEADS, eps=EPS)
    out = jax.block_until_ready(out)

    ref = ref_layer_group(x, attn_params, ffn_params_list, NUM_HEADS, EPS)
    np.testing.assert_allclose(np.asarray(out), np.asarray(ref), rtol=5e-2, atol=5e-2)

    print("KERNEL_OK")
</pallas_src>

<mosaic_0001>
module attributes {stable_mosaic.version = 11 : i64} {
  func.func @_tess_group_kernel(%arg0: i32, %arg1: i32, %arg2: memref<1x8x32xf32, #tpu.memory_space<vmem>>, %arg3: memref<4x32x8xbf16, #tpu.memory_space<vmem>>, %arg4: memref<4x1x8xf32, #tpu.memory_space<vmem>>, %arg5: memref<4x32x8xbf16, #tpu.memory_space<vmem>>, %arg6: memref<4x1x8xf32, #tpu.memory_space<vmem>>, %arg7: memref<4x32x8xbf16, #tpu.memory_space<vmem>>, %arg8: memref<4x1x8xf32, #tpu.memory_space<vmem>>, %arg9: memref<4x8x32xbf16, #tpu.memory_space<vmem>>, %arg10: memref<1x32xf32, #tpu.memory_space<vmem>>, %arg11: memref<1x32xf32, #tpu.memory_space<vmem>>, %arg12: memref<1x32xf32, #tpu.memory_space<vmem>>, %arg13: memref<1x32x64xbf16, #tpu.memory_space<vmem>>, %arg14: memref<1x1x64xf32, #tpu.memory_space<vmem>>, %arg15: memref<1x64x32xbf16, #tpu.memory_space<vmem>>, %arg16: memref<1x1x32xf32, #tpu.memory_space<vmem>>, %arg17: memref<1x1x32xf32, #tpu.memory_space<vmem>>, %arg18: memref<1x1x32xf32, #tpu.memory_space<vmem>>, %arg19: memref<1x8x32xf32, #tpu.memory_space<vmem>>, %arg20: memref<8x32xf32, #tpu.memory_space<vmem>>) attributes {dimension_semantics = [#tpu.dimension_semantics<parallel>, #tpu.dimension_semantics<arbitrary>], iteration_bounds = array<i64: 2, 2>, scalar_prefetch = 0 : i64, scratch_operands = 1 : i64, tpu.core_type = #tpu.core_type<tc>, window_params = [{transform_indices = @transform_0, window_bounds = array<i64: 1, 8, 32>}, {pipeline_mode = #tpu.pipeline_mode<synchronous>, transform_indices = @transform_1, window_bounds = array<i64: 4, 32, 8>}, {pipeline_mode = #tpu.pipeline_mode<synchronous>, transform_indices = @transform_2, window_bounds = array<i64: 4, 1, 8>}, {pipeline_mode = #tpu.pipeline_mode<synchronous>, transform_indices = @transform_3, window_bounds = array<i64: 4, 32, 8>}, {pipeline_mode = #tpu.pipeline_mode<synchronous>, transform_indices = @transform_4, window_bounds = array<i64: 4, 1, 8>}, {pipeline_mode = #tpu.pipeline_mode<synchronous>, transform_indices = @transform_5, window_bounds = array<i64: 4, 32, 8>}, {pipeline_mode = #tpu.pipeline_mode<synchronous>, transform_indices = @transform_6, window_bounds = array<i64: 4, 1, 8>}, {pipeline_mode = #tpu.pipeline_mode<synchronous>, transform_indices = @transform_7, window_bounds = array<i64: 4, 8, 32>}, {pipeline_mode = #tpu.pipeline_mode<synchronous>, transform_indices = @transform_8, window_bounds = array<i64: 1, 32>}, {pipeline_mode = #tpu.pipeline_mode<synchronous>, transform_indices = @transform_9, window_bounds = array<i64: 1, 32>}, {pipeline_mode = #tpu.pipeline_mode<synchronous>, transform_indices = @transform_10, window_bounds = array<i64: 1, 32>}, {transform_indices = @transform_11, window_bounds = array<i64: 1, 32, 64>}, {transform_indices = @transform_12, window_bounds = array<i64: 1, 1, 64>}, {transform_indices = @transform_13, window_bounds = array<i64: 1, 64, 32>}, {transform_indices = @transform_14, window_bounds = array<i64: 1, 1, 32>}, {transform_indices = @transform_15, window_bounds = array<i64: 1, 1, 32>}, {transform_indices = @transform_16, window_bounds = array<i64: 1, 1, 32>}, {transform_indices = @transform_17, window_bounds = array<i64: 1, 8, 32>}]} {
    %c0_i32 = arith.constant 0 : i32
    %0 = arith.cmpi eq, %arg1, %c0_i32 : i32
    %1 = arith.extui %0 : i1 to i32
    %c0_i32_0 = arith.constant 0 : i32
    %2 = arith.cmpi ne, %1, %c0_i32_0 : i32
    scf.if %2 {
      %c0_75 = arith.constant 0 : index
      %c0_76 = arith.constant 0 : index
      %c0_77 = arith.constant 0 : index
      %132 = vector.load %arg2[%c0_75, %c0_76, %c0_77] : memref<1x8x32xf32, #tpu.memory_space<vmem>>, vector<1x8x32xf32>
      %133 = vector.shape_cast %132 : vector<1x8x32xf32> to vector<8x32xf32>
      %c0_78 = arith.constant 0 : index
      %c0_79 = arith.constant 0 : index
      %134 = vector.load %arg20[%c0_78, %c0_79] : memref<8x32xf32, #tpu.memory_space<vmem>>, vector<8x32xf32>
      tpu.vector_store %arg20[%c0_78, %c0_79], %133 {strides = array<i32>} : memref<8x32xf32, #tpu.memory_space<vmem>>, vector<8x32xf32>,
    } else {
    }
    %c0 = arith.constant 0 : index
    %c0_1 = arith.constant 0 : index
    %3 = vector.load %arg20[%c0, %c0_1] : memref<8x32xf32, #tpu.memory_space<vmem>>, vector<8x32xf32>
    %4 = arith.truncf %3 : vector<8x32xf32> to vector<8x32xbf16>
    %5 = vector.shape_cast %4 : vector<8x32xbf16> to vector<1x8x32xbf16>
    %6 = vector.broadcast %5 : vector<1x8x32xbf16> to vector<4x8x32xbf16>
    %c0_2 = arith.constant 0 : index
    %c0_3 = arith.constant 0 : index
    %c0_4 = arith.constant 0 : index
    %7 = vector.load %arg3[%c0_2, %c0_3, %c0_4] : memref<4x32x8xbf16, #tpu.memory_space<vmem>>, vector<4x32x8xbf16>
    "tpu.trace_start"() <{level = 10 : i32, message = "hsk,hkd->hsd"}> : () -> ()
    %cst = arith.constant dense<0.000000e+00> : vector<4x8x8xf32>
    %8 = tpu.matmul %6, %7, %cst {dimension_numbers = #tpu.dot_dimension_numbers<[2], [1], [1], [2], [0, 0, 0, 1, 1, 2], [0], [0]>} : vector<4x8x32xbf16>, vector<4x32x8xbf16>, vector<4x8x8xf32> -> vector<4x8x8xf32>
    "tpu.trace_stop"() : () -> ()
    %c0_5 = arith.constant 0 : index
    %c0_6 = arith.constant 0 : index
    %c0_7 = arith.constant 0 : index
    %9 = vector.load %arg4[%c0_5, %c0_6, %c0_7] : memref<4x1x8xf32, #tpu.memory_space<vmem>>, vector<4x1x8xf32>
    %10 = vector.broadcast %9 : vector<4x1x8xf32> to vector<4x8x8xf32>
    %11 = arith.addf %8, %10 : vector<4x8x8xf32>
    %c0_8 = arith.constant 0 : index
    %c0_9 = arith.constant 0 : index
    %c0_10 = arith.constant 0 : index
    %12 = vector.load %arg5[%c0_8, %c0_9, %c0_10] : memref<4x32x8xbf16, #tpu.memory_space<vmem>>, vector<4x32x8xbf16>
    "tpu.trace_start"() <{level = 10 : i32, message = "hsk,hkd->hsd"}> : () -> ()
    %cst_11 = arith.constant dense<0.000000e+00> : vector<4x8x8xf32>
    %13 = tpu.matmul %6, %12, %cst_11 {dimension_numbers = #tpu.dot_dimension_numbers<[2], [1], [1], [2], [0, 0, 0, 1, 1, 2], [0], [0]>} : vector<4x8x32xbf16>, vector<4x32x8xbf16>, vector<4x8x8xf32> -> vector<4x8x8xf32>
    "tpu.trace_stop"() : () -> ()
    %c0_12 = arith.constant 0 : index
    %c0_13 = arith.constant 0 : index
    %c0_14 = arith.constant 0 : index
    %14 = vector.load %arg6[%c0_12, %c0_13, %c0_14] : memref<4x1x8xf32, #tpu.memory_space<vmem>>, vector<4x1x8xf32>
    %15 = vector.broadcast %14 : vector<4x1x8xf32> to vector<4x8x8xf32>
    %16 = arith.addf %13, %15 : vector<4x8x8xf32>
    %c0_15 = arith.constant 0 : index
    %c0_16 = arith.constant 0 : index
    %c0_17 = arith.constant 0 : index
    %17 = vector.load %arg7[%c0_15, %c0_16, %c0_17] : memref<4x32x8xbf16, #tpu.memory_space<vmem>>, vector<4x32x8xbf16>
    "tpu.trace_start"() <{level = 10 : i32, message = "hsk,hkd->hsd"}> : () -> ()
    %cst_18 = arith.constant dense<0.000000e+00> : vector<4x8x8xf32>
    %18 = tpu.matmul %6, %17, %cst_18 {dimension_numbers = #tpu.dot_dimension_numbers<[2], [1], [1], [2], [0, 0, 0, 1, 1, 2], [0], [0]>} : vector<4x8x32xbf16>, vector<4x32x8xbf16>, vector<4x8x8xf32> -> vector<4x8x8xf32>
    "tpu.trace_stop"() : () -> ()
    %c0_19 = arith.constant 0 : index
    %c0_20 = arith.constant 0 : index
    %c0_21 = arith.constant 0 : index
    %19 = vector.load %arg8[%c0_19, %c0_20, %c0_21] : memref<4x1x8xf32, #tpu.memory_space<vmem>>, vector<4x1x8xf32>
    %20 = vector.broadcast %19 : vector<4x1x8xf32> to vector<4x8x8xf32>
    %21 = arith.addf %18, %20 : vector<4x8x8xf32>
    %22 = arith.truncf %11 : vector<4x8x8xf32> to vector<4x8x8xbf16>
    %23 = arith.truncf %16 : vector<4x8x8xf32> to vector<4x8x8xbf16>
    "tpu.trace_start"() <{level = 10 : i32, message = "hsd,htd->hst"}> : () -> ()
    %cst_22 = arith.constant dense<0.000000e+00> : vector<4x8x8xf32>
    %24 = tpu.matmul %22, %23, %cst_22 {dimension_numbers = #tpu.dot_dimension_numbers<[2], [2], [1], [1], [0, 0, 0, 1, 1, 1], [0], [0]>} : vector<4x8x8xbf16>, vector<4x8x8xbf16>, vector<4x8x8xf32> -> vector<4x8x8xf32>
    "tpu.trace_stop"() : () -> ()
    %cst_23 = arith.constant 0.353553385 : f32
    %25 = vector.broadcast %cst_23 : f32 to vector<4x8x8xf32>
    %26 = arith.mulf %24, %25 : vector<4x8x8xf32>
    %cst_24 = arith.constant dense<0xFF800000> : vector<4x8xf32>
    %27 = vector.multi_reduction <maximumf>, %26, %cst_24 [2] : vector<4x8x8xf32> to vector<4x8xf32>
    %28 = vector.shape_cast %27 : vector<4x8xf32> to vector<4x8x1xf32>
    %29 = vector.broadcast %28 : vector<4x8x1xf32> to vector<4x8x8xf32>
    %30 = arith.subf %26, %29 : vector<4x8x8xf32>
    %31 = math.exp %30 : vector<4x8x8xf32>
    %cst_25 = arith.constant dense<0.000000e+00> : vector<4x8xf32>
    %32 = vector.multi_reduction <add>, %31, %cst_25 [2] : vector<4x8x8xf32> to vector<4x8xf32>
    %33 = vector.shape_cast %32 : vector<4x8xf32> to vector<4x8x1xf32>
    %34 = tpu.reciprocal %33 {approx = true} : vector<4x8x1xf32> -> vector<4x8x1xf32>
    %35 = vector.broadcast %34 : vector<4x8x1xf32> to vector<4x8x8xf32>
    %36 = arith.mulf %31, %35 : vector<4x8x8xf32>
    %37 = arith.truncf %36 : vector<4x8x8xf32> to vector<4x8x8xbf16>
    %38 = arith.truncf %21 : vector<4x8x8xf32> to vector<4x8x8xbf16>
    "tpu.trace_start"() <{level = 10 : i32, message = "hst,htd->hsd"}> : () -> ()
    %cst_26 = arith.constant dense<0.000000e+00> : vector<4x8x8xf32>
    %39 = tpu.matmul %37, %38, %cst_26 {dimension_numbers = #tpu.dot_dimension_numbers<[2], [1], [1], [2], [0, 0, 0, 1, 1, 2], [0], [0]>} : vector<4x8x8xbf16>, vector<4x8x8xbf16>, vector<4x8x8xf32> -> vector<4x8x8xf32>
    "tpu.trace_stop"() : () -> ()
    %40 = arith.truncf %39 : vector<4x8x8xf32> to vector<4x8x8xbf16>
    %c0_27 = arith.constant 0 : index
    %c0_28 = arith.constant 0 : index
    %c0_29 = arith.constant 0 : index
    %41 = vector.load %arg9[%c0_27, %c0_28, %c0_29] : memref<4x8x32xbf16, #tpu.memory_space<vmem>>, vector<4x8x32xbf16>
    "tpu.trace_start"() <{level = 10 : i32, message = "hsd,hdo->hso"}> : () -> ()
    %cst_30 = arith.constant dense<0.000000e+00> : vector<4x8x32xf32>
    %42 = tpu.matmul %40, %41, %cst_30 {dimension_numbers = #tpu.dot_dimension_numbers<[2], [1], [1], [2], [0, 0, 0, 1, 1, 2], [0], [0]>} : vector<4x8x8xbf16>, vector<4x8x32xbf16>, vector<4x8x32xf32> -> vector<4x8x32xf32>
    "tpu.trace_stop"() : () -> ()
    %cst_31 = arith.constant dense<0.000000e+00> : vector<8x32xf32>
    %43 = vector.multi_reduction <add>, %42, %cst_31 [0] : vector<4x8x32xf32> to vector<8x32xf32>
    %c0_32 = arith.constant 0 : index
    %c0_33 = arith.constant 0 : index
    %44 = vector.load %arg10[%c0_32, %c0_33] : memref<1x32xf32, #tpu.memory_space<vmem>>, vector<1x32xf32>
    %45 = vector.broadcast %44 : vector<1x32xf32> to vector<8x32xf32>
    %46 = arith.addf %43, %45 : vector<8x32xf32>
    %47 = arith.addf %3, %46 : vector<8x32xf32>
    %cst_34 = arith.constant dense<0.000000e+00> : vector<8xf32>
    %48 = vector.multi_reduction <add>, %47, %cst_34 [1] : vector<8x32xf32> to vector<8xf32>
    %49 = vector.shape_cast %48 : vector<8xf32> to vector<8x1xf32>
    %cst_35 = arith.constant 3.200000e+01 : f32
    %50 = vector.broadcast %cst_35 : f32 to vector<8x1xf32>
    %51 = arith.divf %49, %50 : vector<8x1xf32>
    %52 = vector.broadcast %51 : vector<8x1xf32> to vector<8x32xf32>
    %53 = arith.subf %47, %52 : vector<8x32xf32>
    %54 = arith.mulf %53, %53 : vector<8x32xf32>
    %cst_36 = arith.constant dense<0.000000e+00> : vector<8xf32>
    %55 = vector.multi_reduction <add>, %54, %cst_36 [1] : vector<8x32xf32> to vector<8xf32>
    %56 = vector.shape_cast %55 : vector<8xf32> to vector<8x1xf32>
    %cst_37 = arith.constant 3.200000e+01 : f32
    %57 = vector.broadcast %cst_37 : f32 to vector<8x1xf32>
    %58 = arith.divf %56, %57 : vector<8x1xf32>
    %59 = vector.broadcast %51 : vector<8x1xf32> to vector<8x32xf32>
    %60 = arith.subf %47, %59 : vector<8x32xf32>
    %cst_38 = arith.constant 9.99999996E-13 : f32
    %61 = vector.broadcast %cst_38 : f32 to vector<8x1xf32>
    %62 = arith.addf %58, %61 : vector<8x1xf32>
    %63 = math.rsqrt %62 : vector<8x1xf32>
    %64 = vector.broadcast %63 : vector<8x1xf32> to vector<8x32xf32>
    %65 = arith.mulf %60, %64 : vector<8x32xf32>
    %c0_39 = arith.constant 0 : index
    %c0_40 = arith.constant 0 : index
    %66 = vector.load %arg11[%c0_39, %c0_40] : memref<1x32xf32, #tpu.memory_space<vmem>>, vector<1x32xf32>
    %67 = vector.broadcast %66 : vector<1x32xf32> to vector<8x32xf32>
    %68 = arith.mulf %65, %67 : vector<8x32xf32>
    %c0_41 = arith.constant 0 : index
    %c0_42 = arith.constant 0 : index
    %69 = vector.load %arg12[%c0_41, %c0_42] : memref<1x32xf32, #tpu.memory_space<vmem>>, vector<1x32xf32>
    %70 = vector.broadcast %69 : vector<1x32xf32> to vector<8x32xf32>
    %71 = arith.addf %68, %70 : vector<8x32xf32>
    %72 = arith.truncf %71 : vector<8x32xf32> to vector<8x32xbf16>
    %c0_43 = arith.constant 0 : index
    %c0_44 = arith.constant 0 : index
    %c0_45 = arith.constant 0 : index
    %73 = vector.load %arg13[%c0_43, %c0_44, %c0_45] : memref<1x32x64xbf16, #tpu.memory_space<vmem>>, vector<1x32x64xbf16>
    %74 = vector.shape_cast %73 : vector<1x32x64xbf16> to vector<32x64xbf16>
    %cst_46 = arith.constant dense<0.000000e+00> : vector<8x64xf32>
    %75 = tpu.matmul %72, %74, %cst_46 {dimension_numbers = #tpu.dot_dimension_numbers<[1], [0], [0], [1], [0, 0, 1, 1], [], []>} : vector<8x32xbf16>, vector<32x64xbf16>, vector<8x64xf32> -> vector<8x64xf32>
    %c0_47 = arith.constant 0 : index
    %c0_48 = arith.constant 0 : index
    %c0_49 = arith.constant 0 : index
    %76 = vector.load %arg14[%c0_47, %c0_48, %c0_49] : memref<1x1x64xf32, #tpu.memory_space<vmem>>, vector<1x1x64xf32>
    %77 = vector.shape_cast %76 : vector<1x1x64xf32> to vector<1x64xf32>
    %78 = vector.broadcast %77 : vector<1x64xf32> to vector<8x64xf32>
    %79 = arith.addf %75, %78 : vector<8x64xf32>
    %cst_50 = arith.constant 5.000000e-01 : f32
    %80 = vector.broadcast %cst_50 : f32 to vector<8x64xf32>
    %81 = arith.mulf %80, %79 : vector<8x64xf32>
    %cst_51 = arith.constant 4.471500e-02 : f32
    %82 = vector.broadcast %cst_51 : f32 to vector<8x64xf32>
    %83 = arith.mulf %82, %79 : vector<8x64xf32>
    %84 = arith.mulf %83, %79 : vector<8x64xf32>
    %85 = arith.mulf %84, %79 : vector<8x64xf32>
    %86 = arith.addf %79, %85 : vector<8x64xf32>
    %cst_52 = arith.constant 0.797884583 : f32
    %87 = vector.broadcast %cst_52 : f32 to vector<8x64xf32>
    %88 = arith.mulf %87, %86 : vector<8x64xf32>
    %89 = math.tanh %88 : vector<8x64xf32>
    %cst_53 = arith.constant 1.000000e+00 : f32
    %90 = vector.broadcast %cst_53 : f32 to vector<8x64xf32>
    %91 = arith.addf %90, %89 : vector<8x64xf32>
    %92 = arith.mulf %81, %91 : vector<8x64xf32>
    %93 = arith.truncf %92 : vector<8x64xf32> to vector<8x64xbf16>
    %c0_54 = arith.constant 0 : index
    %c0_55 = arith.constant 0 : index
    %c0_56 = arith.constant 0 : index
    %94 = vector.load %arg15[%c0_54, %c0_55, %c0_56] : memref<1x64x32xbf16, #tpu.memory_space<vmem>>, vector<1x64x32xbf16>
    %95 = vector.shape_cast %94 : vector<1x64x32xbf16> to vector<64x32xbf16>
    %cst_57 = arith.constant dense<0.000000e+00> : vector<8x32xf32>
    %96 = tpu.matmul %93, %95, %cst_57 {dimension_numbers = #tpu.dot_dimension_numbers<[1], [0], [0], [1], [0, 0, 1, 1], [], []>} : vector<8x64xbf16>, vector<64x32xbf16>, vector<8x32xf32> -> vector<8x32xf32>
    %c0_58 = arith.constant 0 : index
    %c0_59 = arith.constant 0 : index
    %c0_60 = arith.constant 0 : index
    %97 = vector.load %arg16[%c0_58, %c0_59, %c0_60] : memref<1x1x32xf32, #tpu.memory_space<vmem>>, vector<1x1x32xf32>
    %98 = vector.shape_cast %97 : vector<1x1x32xf32> to vector<1x32xf32>
    %99 = vector.broadcast %98 : vector<1x32xf32> to vector<8x32xf32>
    %100 = arith.addf %96, %99 : vector<8x32xf32>
    %101 = arith.addf %100, %71 : vector<8x32xf32>
    %cst_61 = arith.constant dense<0.000000e+00> : vector<8xf32>
    %102 = vector.multi_reduction <add>, %101, %cst_61 [1] : vector<8x32xf32> to vector<8xf32>
    %103 = vector.shape_cast %102 : vector<8xf32> to vector<8x1xf32>
    %cst_62 = arith.constant 3.200000e+01 : f32
    %104 = vector.broadcast %cst_62 : f32 to vector<8x1xf32>
    %105 = arith.divf %103, %104 : vector<8x1xf32>
    %106 = vector.broadcast %105 : vector<8x1xf32> to vector<8x32xf32>
    %107 = arith.subf %101, %106 : vector<8x32xf32>
    %108 = arith.mulf %107, %107 : vector<8x32xf32>
    %cst_63 = arith.constant dense<0.000000e+00> : vector<8xf32>
    %109 = vector.multi_reduction <add>, %108, %cst_63 [1] : vector<8x32xf32> to vector<8xf32>
    %110 = vector.shape_cast %109 : vector<8xf32> to vector<8x1xf32>
    %cst_64 = arith.constant 3.200000e+01 : f32
    %111 = vector.broadcast %cst_64 : f32 to vector<8x1xf32>
    %112 = arith.divf %110, %111 : vector<8x1xf32>
    %113 = vector.broadcast %105 : vector<8x1xf32> to vector<8x32xf32>
    %114 = arith.subf %101, %113 : vector<8x32xf32>
    %cst_65 = arith.constant 9.99999996E-13 : f32
    %115 = vector.broadcast %cst_65 : f32 to vector<8x1xf32>
    %116 = arith.addf %112, %115 : vector<8x1xf32>
    %117 = math.rsqrt %116 : vector<8x1xf32>
    %118 = vector.broadcast %117 : vector<8x1xf32> to vector<8x32xf32>
    %119 = arith.mulf %114, %118 : vector<8x32xf32>
    %c0_66 = arith.constant 0 : index
    %c0_67 = arith.constant 0 : index
    %c0_68 = arith.constant 0 : index
    %120 = vector.load %arg17[%c0_66, %c0_67, %c0_68] : memref<1x1x32xf32, #tpu.memory_space<vmem>>, vector<1x1x32xf32>
    %121 = vector.shape_cast %120 : vector<1x1x32xf32> to vector<1x32xf32>
    %122 = vector.broadcast %121 : vector<1x32xf32> to vector<8x32xf32>
    %123 = arith.mulf %119, %122 : vector<8x32xf32>
    %c0_69 = arith.constant 0 : index
    %c0_70 = arith.constant 0 : index
    %c0_71 = arith.constant 0 : index
    %124 = vector.load %arg18[%c0_69, %c0_70, %c0_71] : memref<1x1x32xf32, #tpu.memory_space<vmem>>, vector<1x1x32xf32>
    %125 = vector.shape_cast %124 : vector<1x1x32xf32> to vector<1x32xf32>
    %126 = vector.broadcast %125 : vector<1x32xf32> to vector<8x32xf32>
    %127 = arith.addf %123, %126 : vector<8x32xf32>
    %c0_72 = arith.constant 0 : index
    %c0_73 = arith.constant 0 : index
    %128 = vector.load %arg20[%c0_72, %c0_73] : memref<8x32xf32, #tpu.memory_space<vmem>>, vector<8x32xf32>
    tpu.vector_store %arg20[%c0_72, %c0_73], %127 {strides = array<i32>} : memref<8x32xf32, #tpu.memory_space<vmem>>, vector<8x32xf32>,
    %c1_i32 = arith.constant 1 : i32
    %129 = arith.cmpi eq, %arg1, %c1_i32 : i32
    %130 = arith.extui %129 : i1 to i32
    %c0_i32_74 = arith.constant 0 : i32
    %131 = arith.cmpi ne, %130, %c0_i32_74 : i32
    scf.if %131 {
      %c0_75 = arith.constant 0 : index
      %c0_76 = arith.constant 0 : index
      %c0_77 = arith.constant 0 : index
      %132 = vector.load %arg19[%c0_75, %c0_76, %c0_77] : memref<1x8x32xf32, #tpu.memory_space<vmem>>, vector<1x8x32xf32>
      %133 = vector.shape_cast %132 : vector<1x8x32xf32> to vector<8x32xf32>
      %134 = vector.shape_cast %127 : vector<8x32xf32> to vector<1x8x32xf32>
      tpu.vector_store %arg19[%c0_75, %c0_76, %c0_77], %134 {strides = array<i32>} : memref<1x8x32xf32, #tpu.memory_space<vmem>>, vector<1x8x32xf32>,
    } else {
    }
    return
  }
  func.func @transform_0(%arg0: i32, %arg1: i32) -> (i32, i32, i32) {
    %c0_i32 = arith.constant 0 : i32
    %c0_i32_0 = arith.constant 0 : i32
    %c0_i32_1 = arith.constant 0 : i32
    return %arg0, %c0_i32, %c0_i32_0 : i32, i32, i32
  }
  func.func @transform_1(%arg0: i32, %arg1: i32) -> (i32, i32, i32) {
    %c0_i32 = arith.constant 0 : i32
    %c0_i32_0 = arith.constant 0 : i32
    %c0_i32_1 = arith.constant 0 : i32
    %c0_i32_2 = arith.constant 0 : i32
    return %c0_i32, %c0_i32_0, %c0_i32_1 : i32, i32, i32
  }
  func.func @transform_2(%arg0: i32, %arg1: i32) -> (i32, i32, i32) {
    %c0_i32 = arith.constant 0 : i32
    %c0_i32_0 = arith.constant 0 : i32
    %c0_i32_1 = arith.constant 0 : i32
    %c0_i32_2 = arith.constant 0 : i32
    return %c0_i32, %c0_i32_0, %c0_i32_1 : i32, i32, i32
  }
  func.func @transform_3(%arg0: i32, %arg1: i32) -> (i32, i32, i32) {
    %c0_i32 = arith.constant 0 : i32
    %c0_i32_0 = arith.constant 0 : i32
    %c0_i32_1 = arith.constant 0 : i32
    %c0_i32_2 = arith.constant 0 : i32
    return %c0_i32, %c0_i32_0, %c0_i32_1 : i32, i32, i32
  }
  func.func @transform_4(%arg0: i32, %arg1: i32) -> (i32, i32, i32) {
    %c0_i32 = arith.constant 0 : i32
    %c0_i32_0 = arith.constant 0 : i32
    %c0_i32_1 = arith.constant 0 : i32
    %c0_i32_2 = arith.constant 0 : i32
    return %c0_i32, %c0_i32_0, %c0_i32_1 : i32, i32, i32
  }
  func.func @transform_5(%arg0: i32, %arg1: i32) -> (i32, i32, i32) {
    %c0_i32 = arith.constant 0 : i32
    %c0_i32_0 = arith.constant 0 : i32
    %c0_i32_1 = arith.constant 0 : i32
    %c0_i32_2 = arith.constant 0 : i32
    return %c0_i32, %c0_i32_0, %c0_i32_1 : i32, i32, i32
  }
  func.func @transform_6(%arg0: i32, %arg1: i32) -> (i32, i32, i32) {
    %c0_i32 = arith.constant 0 : i32
    %c0_i32_0 = arith.constant 0 : i32
    %c0_i32_1 = arith.constant 0 : i32
    %c0_i32_2 = arith.constant 0 : i32
    return %c0_i32, %c0_i32_0, %c0_i32_1 : i32, i32, i32
  }
  func.func @transform_7(%arg0: i32, %arg1: i32) -> (i32, i32, i32) {
    %c0_i32 = arith.constant 0 : i32
    %c0_i32_0 = arith.constant 0 : i32
    %c0_i32_1 = arith.constant 0 : i32
    %c0_i32_2 = arith.constant 0 : i32
    return %c0_i32, %c0_i32_0, %c0_i32_1 : i32, i32, i32
  }
  func.func @transform_8(%arg0: i32, %arg1: i32) -> (i32, i32) {
    %c0_i32 = arith.constant 0 : i32
    %c0_i32_0 = arith.constant 0 : i32
    %c0_i32_1 = arith.constant 0 : i32
    return %c0_i32, %c0_i32_0 : i32, i32
  }
  func.func @transform_9(%arg0: i32, %arg1: i32) -> (i32, i32) {
    %c0_i32 = arith.constant 0 : i32
    %c0_i32_0 = arith.constant 0 : i32
    %c0_i32_1 = arith.constant 0 : i32
    return %c0_i32, %c0_i32_0 : i32, i32
  }
  func.func @transform_10(%arg0: i32, %arg1: i32) -> (i32, i32) {
    %c0_i32 = arith.constant 0 : i32
    %c0_i32_0 = arith.constant 0 : i32
    %c0_i32_1 = arith.constant 0 : i32
    return %c0_i32, %c0_i32_0 : i32, i32
  }
  func.func @transform_11(%arg0: i32, %arg1: i32) -> (i32, i32, i32) {
    %c0_i32 = arith.constant 0 : i32
    %c0_i32_0 = arith.constant 0 : i32
    %c0_i32_1 = arith.constant 0 : i32
    return %arg1, %c0_i32, %c0_i32_0 : i32, i32, i32
  }
  func.func @transform_12(%arg0: i32, %arg1: i32) -> (i32, i32, i32) {
    %c0_i32 = arith.constant 0 : i32
    %c0_i32_0 = arith.constant 0 : i32
    %c0_i32_1 = arith.constant 0 : i32
    return %arg1, %c0_i32, %c0_i32_0 : i32, i32, i32
  }
  func.func @transform_13(%arg0: i32, %arg1: i32) -> (i32, i32, i32) {
    %c0_i32 = arith.constant 0 : i32
    %c0_i32_0 = arith.constant 0 : i32
    %c0_i32_1 = arith.constant 0 : i32
    return %arg1, %c0_i32, %c0_i32_0 : i32, i32, i32
  }
  func.func @transform_14(%arg0: i32, %arg1: i32) -> (i32, i32, i32) {
    %c0_i32 = arith.constant 0 : i32
    %c0_i32_0 = arith.constant 0 : i32
    %c0_i32_1 = arith.constant 0 : i32
    return %arg1, %c0_i32, %c0_i32_0 : i32, i32, i32
  }
  func.func @transform_15(%arg0: i32, %arg1: i32) -> (i32, i32, i32) {
    %c0_i32 = arith.constant 0 : i32
    %c0_i32_0 = arith.constant 0 : i32
    %c0_i32_1 = arith.constant 0 : i32
    return %arg1, %c0_i32, %c0_i32_0 : i32, i32, i32
  }
  func.func @transform_16(%arg0: i32, %arg1: i32) -> (i32, i32, i32) {
    %c0_i32 = arith.constant 0 : i32
    %c0_i32_0 = arith.constant 0 : i32
    %c0_i32_1 = arith.constant 0 : i32
    return %arg1, %c0_i32, %c0_i32_0 : i32, i32, i32
  }
  func.func @transform_17(%arg0: i32, %arg1: i32) -> (i32, i32, i32) {
    %c0_i32 = arith.constant 0 : i32
    %c0_i32_0 = arith.constant 0 : i32
    %c0_i32_1 = arith.constant 0 : i32
    return %arg0, %c0_i32, %c0_i32_0 : i32, i32, i32
  }
}

</mosaic_0001>

<bundles_post_ra>
// kernel: tpu_custom_call.1
= control target key start
LH: loop header
LB: loop body
LE: loop exit
PB: predicated region body
PF: predicated region fallthrough
CT: control target
= control target key end

     0   :  { %s3589_s0 = inlined_call_operand.vmem [shape: f32[2,8,32], index: 0, kind: input, shape index: {}]   ;;  %s3590_s1 = inlined_call_operand.vmem [shape: bf16[4,32,8], index: 1, kind: input, shape index: {}]   ;;  %s3591_s2 = inlined_call_operand.vmem [shape: f32[4,1,8], index: 2, kind: input, shape index: {}]   ;;  %s3592_s3 = inlined_call_operand.vmem [shape: bf16[4,32,8], index: 3, kind: input, shape index: {}]   ;;  %s3593_s4 = inlined_call_operand.vmem [shape: f32[4,1,8], index: 4, kind: input, shape index: {}]   ;;  %s3594_s5 = inlined_call_operand.vmem [shape: bf16[4,32,8], index: 5, kind: input, shape index: {}]   ;;  %s3595_s6 = inlined_call_operand.vmem [shape: f32[4,1,8], index: 6, kind: input, shape index: {}]   ;;  %s3596_s7 = inlined_call_operand.vmem [shape: bf16[4,8,32], index: 7, kind: input, shape index: {}]   ;;  %s3597_s8 = inlined_call_operand.vmem [shape: f32[1,32], index: 8, kind: input, shape index: {}]   ;;  %s3598_s9 = inlined_call_operand.vmem [shape: f32[1,32], index: 9, kind: input, shape index: {}]   ;;  %s3599_s10 = inlined_call_operand.vmem [shape: f32[1,32], index: 10, kind: input, shape index: {}]   ;;  %s3600_s11 = inlined_call_operand.vmem [shape: bf16[2,32,64], index: 11, kind: input, shape index: {}]   ;;  %s3601_s12 = inlined_call_operand.vmem [shape: f32[2,1,64], index: 12, kind: input, shape index: {}]   ;;  %s3602_s13 = inlined_call_operand.vmem [shape: bf16[2,64,32], index: 13, kind: input, shape index: {}]   ;;  %s3603_s14 = inlined_call_operand.vmem [shape: f32[2,1,32], index: 14, kind: input, shape index: {}]   ;;  %s3604_s15 = inlined_call_operand.vmem [shape: f32[2,1,32], index: 15, kind: input, shape index: {}]   ;;  %s3605_s16 = inlined_call_operand.vmem [shape: f32[2,1,32], index: 16, kind: input, shape index: {}]   ;;  %s3606_s17 = inlined_call_operand.hbm [shape: f32[2,8,32], index: 17, kind: output, shape index: {}]  }
   0x1   :  { %3624 = sst [smem:[#allocation18_spill]] %s3589_s0 }
   0x2   :  { %3625 = sst [smem:[#allocation19_spill]] %s3590_s1 }
   0x3   :  { %3626 = sst [smem:[#allocation20_spill]] %s3595_s6 }
   0x4   :  { %3627 = sst [smem:[#allocation21_spill]] %s3596_s7 }
   0x5   :  { %3628 = sst [smem:[#allocation22_spill]] %s3597_s8 }
   0x6   :  { %3629 = sst [smem:[#allocation23_spill]] %s3598_s9 }
   0x7   :  { %3630 = sst [smem:[#allocation24_spill]] %s3599_s10 }
   0x8   :  { %3631 = sst [smem:[#allocation25_spill]] %s3606_s17 }
   0x9   :  { %22 = vsyncpa [#allocation4], 0 }
   0xa   :  { %24 = vsyncpa [#allocation4 + $0x1], 0  ;;  %s3096_s24 = smov 0   ;;  %s3098_s25 = smov 0  }
   0xb   :  { %s3100_s26 = smov 0   ;;  %s3102_s27 = smov 0  }
   0xc   :  { %s3104_s28 = smov 0   ;;  %s3106_s29 = smov 0  }
   0xd   :  { %s3108_s0 = smov 0   ;;  %s3110_s30 = smov 0  }
   0xe LB: > { %3632 = sst [smem:[#allocation6_spill]] %s2973_s24  ;;  %s2434_s18 = sadd.s32 4294967295, %s3001_s30   ;;  %s3001_s30 = sphi %s3110_s30, %s30_s30   ;;  %s2997_s0 = sphi %s3108_s0, %s3669_s0   ;;  %s2993_s29 = sphi %s3106_s29, %s3668_s29   ;;  %s2989_s28 = sphi %s3104_s28, %s3667_s28   ;;  %s2985_s27 = sphi %s3102_s27, %s3666_s27   ;;  %s2981_s26 = sphi %s3100_s26, %s3665_s26   ;;  %s2977_s25 = sphi %s3098_s25, %s3664_s25   ;;  %s2973_s24 = sphi %s3096_s24, %s3663_s24  }
   0xf   : > { %3633 = sst [smem:[#allocation7_spill]] %s2977_s25  ;;  %s2435_s19 = sadd.s32 4294967294, %s3001_s30  }
  0x10   : > { %3634 = sst [smem:[#allocation8_spill]] %s2981_s26  ;;  %s39_s1 = sadd.s32 1, %s2993_s29 }
  0x11   : > { %3635 = sst [smem:[#allocation9_spill]] %s2989_s28  ;;  %p40_p0 = scmp.ge.s32.totalorder %s39_s1, 2 }
  0x12   : > { %3636 = sst [smem:[#allocation10_spill]] %s2993_s29  ;;  %s42_s20 = sadd.s32 1, %s2997_s0 }
  0x13   : > { %3637 = sst [smem:[#allocation11_spill]] %s2997_s0  ;;  %p451_p1 = scmp.ne.s32.totalorder %s2981_s26, %s2977_s25 }
  0x14   : > { %3638 = sst [smem:[#allocation12_spill]] %s3001_s30  ;;  %p452_p2 = scmp.eq.s32.totalorder %s2434_s18, 3 }
  0x15   : > { %s3671_s1 = smov (%p40_p0, %s39_s1), 0  ;;  %s3673_s20 = smov (!%p40_p0, %s42_s20), %s2997_s0 }
  0x16   : > { %3639 = sst [smem:[#allocation13_spill]] %s3671_s1  ;;  %p3145_p3 = por %p452_p2, %p451_p1 }
  0x17   : > { %p457_p4 = scmp.ne.s32.totalorder %s2977_s25, %s2973_s24  ;;  %p44_p5 = scmp.ge.s32.totalorder %s3673_s20, 2 }
  0x18   : > { %s3640_s21 = scalar_select %p3145_p3, 1, 0 }
  0x19   : > { %p458_p6 = scmp.eq.s32.totalorder %s2435_s19, 3  ;;  %p2438_p7 = scmp.ge.s32.totalorder %s3001_s30, 1 }
  0x1a   : > { %3641 = sst [smem:[#allocation14_spill]] %s3640_s21  ;;  %p553_p8 = scmp.lt.s32.totalorder %s3001_s30, 5 }
  0x1b   : > { %s3675_s20 = smov (%p44_p5, %s3673_s20), 0  ;;  %p3155_p9 = por %p458_p6, %p457_p4 }
  0x1c   : > { %3642 = sst [smem:[#allocation15_spill]] %s3675_s20  ;;  %p554_p10 = pnand %p2438_p7, %p553_p8 }
  0x1d   : > { %s3643_s22 = scalar_select %p3155_p9, 1, 0 }
  0x1e   : > { %s438_s23 = ssub.s32 %s2997_s0, %s3675_s20  ;;  %s441_s18 = sadd.s32 1, %s2981_s26 }
  0x1f   : > { %3644 = sst [smem:[#allocation16_spill]] %s3643_s22  ;;  %p439_p11 = scmp.eq.s32.totalorder %s438_s23, 0 }
  0x20   : > { %557 = sbr.rel (%p554_p10) target bundleno = 2269 (0x8dd), region = 88  ;;  %s3616_s19 = sand.u32 (!%p554_p10), 1, %s2977_s25  }
  0x21   : > { %s3163_s1 = scalar_select %p439_p11, %s2981_s26, %s441_s18  }
  0x22   : > { %p626_p12 = scmp.lt.s32.totalorder (!%p554_p10), %s2989_s28, 1  ;;  %s3169_s29 = sshll.u32 (!%p554_p10), %s3616_s19, 3 }
  0x23   : > { %3645 = sst [smem:[#allocation17_spill]] %s3163_s1  ;;  %p630_p13 = scmp.lt.s32.totalorder (!%p554_p10), %s2985_s27, 1 }
  0x24   : > { %s3646_s1 = sld [smem:[#allocation18_spill]] (!%p554_p10)  ;;  %s625_s25 = scalar_lea.vmem (!%p554_p10), [#allocation3], %s3169_s29 }
  0x25   : > { %s627_s22 = scalar_select %p626_p12, %s2989_s28, 1 }
  0x26   : > { %s3174_s20 = scalar_select %p630_p13, %s2985_s27, 1 }
  0x27   : > { %s2440_s23 = sshll.u32 %s627_s22, 3  ;;  %p2445_p0 = scmp.ne.s32.totalorder %s2985_s27, 0 }
  0x28   : > { %s2526_s24 = sshll.u32 %s3174_s20, 4  ;;  %s637_s28 = scalar_lea.vmem %s3601_s12, %s3174_s20 }
  0x29   : > { %s3183_s17 = scalar_lea.vmem %s3600_s11, %s2526_s24  ;;  %s2527_s10 = sshll.u32 %s3174_s20, 5 }
  0x2a   : > { %s629_s26 = scalar_lea.vmem %s3646_s1, %s2440_s23  ;;  %s645_s7 = scalar_lea.vmem %s3603_s14, %s3174_s20 }
  0x2b   : > { %s3197_s0 = scalar_lea.vmem %s3602_s13, %s2527_s10  ;;  %s648_s30 = scalar_lea.vmem %s3604_s15, %s3174_s20 }
  0x2c   : > { %s651_s18 = scalar_lea.vmem %s3605_s16, %s3174_s20  ;;  %656 = sbr.rel (%p2445_p0) target bundleno = 51 (0x33), region = 92 }
  0x31   : > { %v657_v0 = vld [vmem:[%s629_s26] sm:$0xff]  ;;  %vm658_vm0 = vcmask 261120  }
  0x32   : > { %659 = vst.msk [vmem:[#allocation2] sm:$0xff] %vm658_vm0, %v657_v0 }
  0x33 PF: > { %s3647_s9 = sld [smem:[#allocation19_spill]]  ;;  %v3003_v2 = vmov 0.0   ;;  %vm3004_vm1 = vmmov 0   ;;  %vm718_vm2 = vcmask 261120   ;;  %v2865_v12 = vld [vmem:[%s3592_s3 + $0x8] sm:$0xff]   ;;  %v2866_v13 = vld [vmem:[%s3592_s3 + $0x18] sm:$0xff]  }
  0x34   : > { %2596 = vmatprep.subr.bf16.mxu0 %v3003_v2  ;;  %2604 = vmatprep.subr.bf16.mxu1 %v3003_v2  ;;  %v2867_v14 = vld [vmem:[%s3592_s3] sm:$0xff]   ;;  %v2868_v15 = vld [vmem:[%s3592_s3 + $0x10] sm:$0xff]   ;;  %v2869_v16 = vld [vmem:[%s3592_s3 + $0x28] sm:$0xff]   ;;  %vm1430_vm3 = vcmask 64512   ;;  %s3648_s26 = sld [smem:[#allocation20_spill]]  ;;  %vm1674_vm4 = vcmask 1043456  }
  0x35   : > { %2600 = vmatprep.mubr.msk.bf16.mxu0 %vm3004_vm1, %v3003_v2  ;;  %2608 = vmatprep.mubr.msk.bf16.mxu1 %vm3004_vm1, %v3003_v2  ;;  %v2870_v17 = vld [vmem:[%s3592_s3 + $0x38] sm:$0xff]   ;;  %v2871_v18 = vld [vmem:[%s3592_s3 + $0x20] sm:$0xff]   ;;  %v2872_v19 = vld [vmem:[%s3592_s3 + $0x30] sm:$0xff]   ;;  %s3652_s24 = sld [smem:[#allocation22_spill]]  ;;  %vm2210_vm5 = vcmask 523264   ;;  %p2521_p1 = scmp.ne.s32.totalorder %s2985_s27, 1 }
  0x36   : > { %v2873_v20 = vld [vmem:[%s3594_s5 + $0x8] sm:$0xff]   ;;  %v2874_v21 = vld [vmem:[%s3594_s5] sm:$0xff]   ;;  %v2875_v22 = vld [vmem:[%s3594_s5 + $0x18] sm:$0xff]   ;;  %s3653_s10 = sld [smem:[#allocation23_spill]] }
  0x37   : > { %v2876_v23 = vld [vmem:[%s3594_s5 + $0x10] sm:$0xff]   ;;  %v2877_v24 = vld [vmem:[%s3594_s5 + $0x28] sm:$0xff]   ;;  %v2878_v25 = vld [vmem:[%s3594_s5 + $0x20] sm:$0xff]   ;;  %s3654_s1 = sld [smem:[#allocation24_spill]] }
  0x38   : > { %v2879_v26 = vld [vmem:[%s3594_s5 + $0x38] sm:$0xff]   ;;  %v2880_v27 = vld [vmem:[%s3594_s5 + $0x30] sm:$0xff]   ;;  %v2462_v43 = vld [vmem:[%s3593_s4] ss:$0 sm:$0xff] }
  0x39   : > { %v2857_v1 = vld [vmem:[%s3647_s9 + $0x8] sm:$0xff]   ;;  %v2858_v3 = vld [vmem:[%s3647_s9 + $0x18] sm:$0xff]   ;;  %v2859_v4 = vld [vmem:[%s3647_s9] sm:$0xff]  }
  0x3a   : > { %2597 = vmatpush3.bf16.msra.mxu0 %v2857_v1  ;;  %2605 = vmatpush3.bf16.msra.mxu1 %v2858_v3  ;;  %v2860_v5 = vld [vmem:[%s3647_s9 + $0x10] sm:$0xff]   ;;  %v3229_v6 = vld [vmem:[#allocation2] sm:$0xff]  ;;  %v2861_v8 = vld [vmem:[%s3647_s9 + $0x28] sm:$0xff]   ;;  %s3649_s23 = smov %s3648_s26 }
  0x3b   : > { %2598 = vmatprep.subr.bf16.mxu0 %v3003_v2  ;;  %2606 = vmatprep.subr.bf16.mxu1 %v3003_v2  ;;  %v3233_v7 = vpack.c.bf16 %v3229_v6, %v3229_v6  ;;  %v2862_v9 = vld [vmem:[%s3647_s9 + $0x38] sm:$0xff]   ;;  %v2863_v10 = vld [vmem:[%s3647_s9 + $0x20] sm:$0xff]   ;;  %v2864_v11 = vld [vmem:[%s3647_s9 + $0x30] sm:$0xff]  }
  0x3c   : > { %v2463_v45 = vld [vmem:[%s3593_s4 + $0x1] ss:$0 sm:$0xff]  ;;  %v2446_v53 = vld [vmem:[%s3591_s2] ss:$0 sm:$0xff]  ;;  %v2464_v61 = vld [vmem:[%s3593_s4 + $0x2] ss:$0 sm:$0xff] }
  0x3d   : > { %v2447_v56 = vld [vmem:[%s3591_s2 + $0x1] ss:$0 sm:$0xff]  ;;  %v2465_v0 = vld [vmem:[%s3593_s4 + $0x3] ss:$0 sm:$0xff] }
  0x3e   : > { %2599 = vmatpush3.bf16.msra.mxu0 %v2859_v4  ;;  %2607 = vmatpush3.bf16.msra.mxu1 %v2860_v5 }
  0x3f   : > { %2612 = vmatprep.subr.bf16.mxu0 %v3003_v2  ;;  %2620 = vmatprep.subr.bf16.mxu1 %v3003_v2 }
  0x41   : > { %2601 = vmatmul.mubr.msk.bf16.vlgmr.msra.gmra.mxu0 %vm718_vm2, %v3233_v7  ;;  %2609 = vmatmul.mubr.msk.bf16.vlgmr.msra.gmra.mxu1 %vm718_vm2, %v3233_v7 }
  0x42   : > { %2613 = vmatpush3.bf16.msra.mxu0 %v2861_v8  ;;  %2621 = vmatpush3.bf16.msra.mxu1 %v2862_v9 }
  0x43   : > { %2614 = vmatprep.subr.bf16.mxu0 %v3003_v2  ;;  %2622 = vmatprep.subr.bf16.mxu1 %v3003_v2 }
  0x44   : > { %2616 = vmatprep.mubr.msk.bf16.mxu0 %vm3004_vm1, %v3003_v2  ;;  %2624 = vmatprep.mubr.msk.bf16.mxu1 %vm3004_vm1, %v3003_v2 }
  0x46   : > { %2615 = vmatpush3.bf16.msra.mxu0 %v2863_v10  ;;  %2623 = vmatpush3.bf16.msra.mxu1 %v2864_v11 }
  0x47   : > { %2628 = vmatprep.subr.bf16.mxu0 %v3003_v2  ;;  %2636 = vmatprep.subr.bf16.mxu1 %v3003_v2 }
  0x49   : > { %2617 = vmatmul.mubr.msk.bf16.vlgmr.msra.gmra.mxu0 %vm718_vm2, %v3233_v7  ;;  %2625 = vmatmul.mubr.msk.bf16.vlgmr.msra.gmra.mxu1 %vm718_vm2, %v3233_v7 }
  0x4a   : > { %2629 = vmatpush3.bf16.msra.mxu0 %v2865_v12  ;;  %2637 = vmatpush3.bf16.msra.mxu1 %v2866_v13  ;;  %v2448_v13 = vld [vmem:[%s3591_s2 + $0x2] ss:$0 sm:$0xff] }
  0x4b   : > { %2630 = vmatprep.subr.bf16.mxu0 %v3003_v2  ;;  %2638 = vmatprep.subr.bf16.mxu1 %v3003_v2 }
  0x4c   : > { %2632 = vmatprep.mubr.msk.bf16.mxu0 %vm3004_vm1, %v3003_v2  ;;  %2640 = vmatprep.mubr.msk.bf16.mxu1 %vm3004_vm1, %v3003_v2 }
  0x4e   : > { %2631 = vmatpush3.bf16.msra.mxu0 %v2867_v14  ;;  %2639 = vmatpush3.bf16.msra.mxu1 %v2868_v15 }
  0x4f   : > { %2644 = vmatprep.subr.bf16.mxu0 %v3003_v2  ;;  %2652 = vmatprep.subr.bf16.mxu1 %v3003_v2 }
  0x51   : > { %2633 = vmatmul.mubr.msk.bf16.vlgmr.msra.gmra.mxu0 %vm718_vm2, %v3233_v7  ;;  %2641 = vmatmul.mubr.msk.bf16.vlgmr.msra.gmra.mxu1 %vm718_vm2, %v3233_v7 }
  0x52   : > { %2645 = vmatpush3.bf16.msra.mxu0 %v2869_v16  ;;  %2653 = vmatpush3.bf16.msra.mxu1 %v2870_v17  ;;  %v2449_v16 = vld [vmem:[%s3591_s2 + $0x3] ss:$0 sm:$0xff] }
  0x53   : > { %2646 = vmatprep.subr.bf16.mxu0 %v3003_v2  ;;  %2654 = vmatprep.subr.bf16.mxu1 %v3003_v2 }
  0x54   : > { %2648 = vmatprep.mubr.msk.bf16.mxu0 %vm3004_vm1, %v3003_v2  ;;  %2656 = vmatprep.mubr.msk.bf16.mxu1 %vm3004_vm1, %v3003_v2 }
  0x56   : > { %2647 = vmatpush3.bf16.msra.mxu0 %v2871_v18  ;;  %2655 = vmatpush3.bf16.msra.mxu1 %v2872_v19 }
  0x57   : > { %2660 = vmatprep.subr.bf16.mxu0 %v3003_v2  ;;  %2668 = vmatprep.subr.bf16.mxu1 %v3003_v2 }
  0x59   : > { %2649 = vmatmul.mubr.msk.bf16.vlgmr.msra.gmra.mxu0 %vm718_vm2, %v3233_v7  ;;  %2657 = vmatmul.mubr.msk.bf16.vlgmr.msra.gmra.mxu1 %vm718_vm2, %v3233_v7 }
  0x5a   : > { %2664 = vmatprep.mubr.msk.bf16.mxu0 %vm3004_vm1, %v3003_v2  ;;  %2672 = vmatprep.mubr.msk.bf16.mxu1 %vm3004_vm1, %v3003_v2 }
  0x5b   : > { %2661 = vmatpush3.bf16.msra.mxu0 %v2873_v20  ;;  %2669 = vmatpush3.bf16.msra.mxu1 %v2875_v22 }
  0x5c   : > { %2662 = vmatprep.subr.bf16.mxu0 %v3003_v2  ;;  %2670 = vmatprep.subr.bf16.mxu1 %v3003_v2 }
  0x5f   : > { %2663 = vmatpush3.bf16.msra.mxu0 %v2874_v21  ;;  %2671 = vmatpush3.bf16.msra.mxu1 %v2876_v23 }
  0x60   : > { %2676 = vmatprep.subr.bf16.mxu0 %v3003_v2  ;;  %2684 = vmatprep.subr.bf16.mxu1 %v3003_v2 }
  0x62   : > { %2665 = vmatmul.mubr.msk.bf16.vlgmr.msra.gmra.mxu0 %vm718_vm2, %v3233_v7  ;;  %2673 = vmatmul.mubr.msk.bf16.vlgmr.msra.gmra.mxu1 %vm718_vm2, %v3233_v7 }
  0x63   : > { %2677 = vmatpush3.bf16.msra.mxu0 %v2877_v24  ;;  %2680 = vmatprep.mubr.msk.bf16.mxu0 %vm3004_vm1, %v3003_v2 }
  0x64   : > { %2678 = vmatprep.subr.bf16.mxu0 %v3003_v2  ;;  %2685 = vmatpush3.bf16.msra.mxu1 %v2879_v26  ;;  %v2478_v26 = vld [vmem:[%s3648_s26] ss:$0 sm:$0xff]  ;;  %s3650_s26 = sld [smem:[#allocation21_spill]] }
  0x65   : > { %2686 = vmatprep.subr.bf16.mxu1 %v3003_v2  ;;  %2688 = vmatprep.mubr.msk.bf16.mxu1 %vm3004_vm1, %v3003_v2 }
  0x67   : > { %2679 = vmatpush3.bf16.msra.mxu0 %v2878_v25 }
  0x68   : > { %2692 = vmatprep.subr.bf16.mxu0 %v3003_v2  ;;  %2687 = vmatpush3.bf16.msra.mxu1 %v2880_v27 }
  0x69   : > { %2698 = vmatprep.subr.bf16.mxu1 %v3003_v2 }
  0x6a   : > { %2681 = vmatmul.mubr.msk.bf16.vlgmr.msra.gmra.mxu0 %vm718_vm2, %v3233_v7  ;;  %s3651_s19 = smov %s3650_s26 }
  0x6b   : > { %2694 = vmatprep.mubr.msk.bf16.mxu0 %vm3004_vm1, %v3003_v2  ;;  %2689 = vmatmul.mubr.msk.bf16.vlgmr.msra.gmra.mxu1 %vm718_vm2, %v3233_v7 }
  0x6c   : > { %2700 = vmatprep.mubr.msk.bf16.mxu1 %vm3004_vm1, %v3003_v2 }
 0x101   : > { %v756_v28 = vpop.f32.mrf.mxu0  ;;  %v808_v29 = vpop.f32.mrf.mxu1 }
 0x102   : > { %v757_v62 = vadd.f32 %v2446_v53, %v756_v28  ;;  %v809_v1 = vadd.f32 %v2447_v56, %v808_v29 }
 0x103   : > { %v2602_v30 = vpop.f32.mrf.mxu0  ;;  %v2610_v31 = vpop.f32.mrf.mxu1 }
 0x104   : > { %v1422_v9 = vpack.c.bf16 %v757_v62, %v757_v62  ;;  %v1423_v12 = vpack.c.bf16 %v809_v1, %v809_v1  ;;  %v2479_v30 = vld [vmem:[%s3649_s23 + $0x1] ss:$0 sm:$0xff] }
 0x105   : > { %v759_v32 = vpop.f32.mrf.mxu0  ;;  %v811_v33 = vpop.f32.mrf.mxu1 }
 0x107   : > { %v2603_v34 = vpop.f32.mrf.mxu0  ;;  %v2611_v35 = vpop.f32.mrf.mxu1 }
 0x109   : > { %v860_v36 = vpop.f32.mrf.mxu0  ;;  %v912_v37 = vpop.f32.mrf.mxu1 }
 0x10a   : > { %v861_v21 = vadd.f32 %v2448_v13, %v860_v36  ;;  %v913_v23 = vadd.f32 %v2449_v16, %v912_v37 }
 0x10b   : > { %v2618_v38 = vpop.f32.mrf.mxu0  ;;  %v2626_v39 = vpop.f32.mrf.mxu1 }
 0x10c   : > { %v1424_v24 = vpack.c.bf16 %v861_v21, %v861_v21  ;;  %v1425_v25 = vpack.c.bf16 %v913_v23, %v913_v23 }
 0x10d   : > { %v863_v40 = vpop.f32.mrf.mxu0  ;;  %v915_v41 = vpop.f32.mrf.mxu1 }
 0x10f   : > { %v2619_v42 = vpop.f32.mrf.mxu0  ;;  %v2627_v44 = vpop.f32.mrf.mxu1 }
 0x111   : > { %v1008_v46 = vpop.f32.mrf.mxu0  ;;  %v1060_v48 = vpop.f32.mrf.mxu1 }
 0x112   : > { %v1009_v47 = vadd.f32 %v2462_v43, %v1008_v46  ;;  %v1061_v49 = vadd.f32 %v2463_v45, %v1060_v48 }
 0x113   : > { %v2634_v50 = vpop.f32.mrf.mxu0  ;;  %v2642_v52 = vpop.f32.mrf.mxu1 }
 0x114   : > { %v1426_v51 = vpack.c.bf16 %v1009_v47, %v1009_v47  ;;  %v1427_v54 = vpack.c.bf16 %v1061_v49, %v1061_v49 }
 0x115   : > { %v1011_v55 = vpop.f32.mrf.mxu0  ;;  %v1063_v58 = vpop.f32.mrf.mxu1 }
 0x116   : > { %v1435_v57 = vsel %vm1430_vm3, %v1426_v51, 0  ;;  %v1481_v59 = vsel %vm1430_vm3, %v1427_v54, 0 }
 0x117   : > { %v2635_v60 = vpop.f32.mrf.mxu0  ;;  %2693 = vmatpush3.bf16.xpose.msra.mxu0 %v1435_v57  ;;  %v2643_v63 = vpop.f32.mrf.mxu1  ;;  %2699 = vmatpush3.bf16.xpose.msra.mxu1 %v1481_v59 }
 0x118   : > { %2704 = vmatprep.subr.bf16.mxu0 %v3003_v2  ;;  %2710 = vmatprep.subr.bf16.mxu1 %v3003_v2 }
 0x119   : > { %v1112_v3 = vpop.f32.mrf.mxu0  ;;  %v1164_v5 = vpop.f32.mrf.mxu1 }
 0x11a   : > { %v1113_v4 = vadd.f32 %v2464_v61, %v1112_v3  ;;  %v1165_v7 = vadd.f32 %v2465_v0, %v1164_v5 }
 0x11b   : > { %v2650_v8 = vpop.f32.mrf.mxu0  ;;  %v2658_v11 = vpop.f32.mrf.mxu1 }
 0x11c   : > { %v1428_v10 = vpack.c.bf16 %v1113_v4, %v1113_v4  ;;  %v1429_v14 = vpack.c.bf16 %v1165_v7, %v1165_v7 }
 0x11d   : > { %v1115_v15 = vpop.f32.mrf.mxu0  ;;  %v1167_v18 = vpop.f32.mrf.mxu1 }
 0x11e   : > { %v1527_v17 = vsel %vm1430_vm3, %v1428_v10, 0  ;;  %2695 = vmatmul.mubr.msk.bf16.vlgmr.msra.gmra.mxu0 %vm1430_vm3, %v1422_v9  ;;  %v1573_v19 = vsel %vm1430_vm3, %v1429_v14, 0  ;;  %2701 = vmatmul.mubr.msk.bf16.vlgmr.msra.gmra.mxu1 %vm1430_vm3, %v1423_v12 }
 0x11f   : > { %v2651_v20 = vpop.f32.mrf.mxu0  ;;  %2705 = vmatpush3.bf16.xpose.msra.mxu0 %v1527_v17  ;;  %v2659_v22 = vpop.f32.mrf.mxu1  ;;  %2711 = vmatpush3.bf16.xpose.msra.mxu1 %v1573_v19 }
 0x120   : > { %2706 = vmatprep.mubr.msk.bf16.mxu0 %vm3004_vm1, %v3003_v2  ;;  %2712 = vmatprep.mubr.msk.bf16.mxu1 %vm3004_vm1, %v3003_v2 }
 0x121   : > { %2716 = vmatprep.subr.bf16.mxu0 %v3003_v2  ;;  %2722 = vmatprep.subr.bf16.mxu1 %v3003_v2 }
 0x122   : > { %v1260_v27 = vpop.f32.mrf.mxu0  ;;  %v1312_v33 = vpop.f32.mrf.mxu1 }
 0x123   : > { %v1261_v28 = vadd.f32 %v2478_v26, %v1260_v27  ;;  %v1313_v35 = vadd.f32 %v2479_v30, %v1312_v33 }
 0x124   : > { %v2666_v29 = vpop.f32.mrf.mxu0  ;;  %v2674_v37 = vpop.f32.mrf.mxu1 }
 0x125   : > { %v1667_v31 = vpack.c.bf16 %v1261_v28, %v1261_v28  ;;  %v1668_v38 = vpack.c.bf16 %v1313_v35, %v1313_v35  ;;  %v2481_v37 = vld [vmem:[%s3649_s23 + $0x3] ss:$0 sm:$0xff] }
 0x126   : > { %2707 = vmatmul.mubr.msk.bf16.vlgmr.msra.gmra.mxu0 %vm1430_vm3, %v1424_v24  ;;  %2713 = vmatmul.mubr.msk.bf16.vlgmr.msra.gmra.mxu1 %vm1430_vm3, %v1425_v25  ;;  %v1263_v32 = vpop.f32.mrf.mxu0  ;;  %v1315_v39 = vpop.f32.mrf.mxu1 }
 0x127   : > { %2718 = vmatprep.mubr.msk.bf16.mxu0 %vm3004_vm1, %v3003_v2  ;;  %2724 = vmatprep.mubr.msk.bf16.mxu1 %vm3004_vm1, %v3003_v2  ;;  %v1676_v34 = vsel %vm1674_vm4, %v1667_v31, 0  ;;  %v1722_v41 = vsel %vm1674_vm4, %v1668_v38, 0 }
 0x128   : > { %v2667_v36 = vpop.f32.mrf.mxu0  ;;  %2717 = vmatpush3.bf16.msra.mxu0 %v1676_v34  ;;  %v2675_v42 = vpop.f32.mrf.mxu1  ;;  %2723 = vmatpush3.bf16.msra.mxu1 %v1722_v41  ;;  %v2480_v34 = vld [vmem:[%s3649_s23 + $0x2] ss:$0 sm:$0xff] }
 0x129   : > { %2728 = vmatprep.subr.bf16.mxu0 %v3003_v2  ;;  %2734 = vmatprep.subr.bf16.mxu1 %v3003_v2 }
 0x12a   : > { %v3417_v40 = vpop.f32.mrf.mxu0 }
 0x12b   : > { %v3421_v45 = vpop.f32.mrf.mxu1  ;;  %v1365_v36 = vadd.f32 %v2480_v34, %v3417_v40 }
 0x12c   : > { %v2682_v43 = vpop.f32.mrf.mxu0  ;;  %v1417_v42 = vadd.f32 %v2481_v37, %v3421_v45  ;;  %v1860_v45 = vld [vmem:[%s3650_s26] sm:$0xf] }
 0x12d   : > { %v2690_v47 = vpop.f32.mrf.mxu1  ;;  %v1669_v41 = vpack.c.bf16 %v1365_v36, %v1365_v36 }
 0x12e   : > { %v1367_v44 = vpop.f32.mrf.mxu0 }
 0x12f   : > { %v1419_v48 = vpop.f32.mrf.mxu1  ;;  %v1768_v47 = vsel %vm1674_vm4, %v1669_v41, 0  ;;  %v2506_v41 = vld [vmem:[%s3652_s24] ss:$0 sm:$0xff] }
 0x130   : > { %v2683_v46 = vpop.f32.mrf.mxu0  ;;  %v1670_v48 = vpack.c.bf16 %v1417_v42, %v1417_v42 }
 0x131   : > { %v2691_v49 = vpop.f32.mrf.mxu1 }
 0x1de   : > { %v1471_v50 = vpop.f32.mrf.mxu0  ;;  %v1517_v52 = vpop.f32.mrf.mxu1 }
 0x1df   : > { %v1615_v51 = vmul.f32 0.35355338, %v1471_v50  ;;  %v1616_v54 = vmul.f32 0.35355338, %v1517_v52 }
 0x1e0   : > { %v2696_v53 = vpop.f32.mrf.mxu0  ;;  %v2702_v55 = vpop.f32.mrf.mxu1 }
 0x1e1   : > { %v1619_v56 = vsel %vm1430_vm3, %v1615_v51, -inf  ;;  %v1622_v61 = vsel %vm1430_vm3, %v1616_v54, -inf }
 0x1e2   : > { %1620 = vmax.xlane.f32.xlu0 %v1619_v56  ;;  %v1474_v57 = vpop.f32.mrf.mxu0  ;;  %v1520_v58 = vpop.f32.mrf.mxu1 }
 0x1e3   : > { %v1861_v58 = vld [vmem:[%s3651_s19 + $0x4] sm:$0xf] }
 0x1e4   : > { %v2697_v59 = vpop.f32.mrf.mxu0  ;;  %v2703_v60 = vpop.f32.mrf.mxu1 }
 0x1e5   : > { %v1914_v59 = vsel %vm1674_vm4, %v1861_v58, 0  ;;  %v1862_v60 = vld [vmem:[%s3651_s19 + $0x8] sm:$0xf] }
 0x1e6   : > { %1623 = vmax.xlane.f32.xlu0 %v1622_v61  ;;  %v1563_v62 = vpop.f32.mrf.mxu0  ;;  %v1609_v63 = vpop.f32.mrf.mxu1 }
 0x1e7   : > { %v1617_v0 = vmul.f32 0.35355338, %v1563_v62  ;;  %v1618_v3 = vmul.f32 0.35355338, %v1609_v63  ;;  %v1960_v63 = vsel %vm1674_vm4, %v1862_v60, 0 }
 0x1e8   : > { %v2708_v1 = vpop.f32.mrf.mxu0  ;;  %v2714_v4 = vpop.f32.mrf.mxu1 }
 0x1e9   : > { %v1625_v5 = vsel %vm1430_vm3, %v1617_v0, -inf  ;;  %v1628_v11 = vsel %vm1430_vm3, %v1618_v3, -inf  ;;  %v1863_v1 = vld [vmem:[%s3651_s19 + $0xc] sm:$0xf] }
 0x1ea   : > { %1626 = vmax.xlane.f32.xlu1 %v1625_v5  ;;  %v1566_v7 = vpop.f32.mrf.mxu0  ;;  %v1612_v8 = vpop.f32.mrf.mxu1 }
 0x1eb   : > { %v2006_v7 = vsel %vm1674_vm4, %v1863_v1, 0  ;;  %v2883_v1 = vld [vmem:[%s3197_s0 + $0x18] sm:$0xff]  }
 0x1ec   : > { %v2709_v9 = vpop.f32.mrf.mxu0  ;;  %v2715_v10 = vpop.f32.mrf.mxu1 }
 0x1ee   : > { %1629 = vmax.xlane.f32.xlu1 %v1628_v11 }
 0x26b   : > { %v1621_v12 = vpop.xlane.xlu0 %1620 }
 0x26c   : > { %v1631_v13 = vsub.f32 %v1615_v51, %v1621_v12  ;;  %v1814_v51 = vsel %vm1674_vm4, %v1670_v48, 0 }
 0x26e   : > { %v1635_v14 = vmul.f32 1.442695, %v1631_v13 }
 0x26f   : > { %v1624_v15 = vpop.xlane.xlu0 %1623 }
 0x270   : > { %2887 = vpow2.f32 %v1635_v14  ;;  %v1632_v16 = vsub.f32 %v1616_v54, %v1624_v15  ;;  %v1868_v54 = vsel %vm1674_vm4, %v1860_v45, 0 }
 0x272   : > { %v1637_v17 = vmul.f32 1.442695, %v1632_v16 }
 0x273   : > { %v1627_v18 = vpop.xlane.xlu1 %1626 }
 0x274   : > { %2889 = vpow2.f32 %v1637_v17  ;;  %v1633_v19 = vsub.f32 %v1617_v0, %v1627_v18 }
 0x276   : > { %v1639_v20 = vmul.f32 1.442695, %v1633_v19 }
 0x277   : > { %v1630_v21 = vpop.xlane.xlu1 %1629 }
 0x278   : > { %2891 = vpow2.f32 %v1639_v20  ;;  %v1634_v22 = vsub.f32 %v1618_v3, %v1630_v21 }
 0x27a   : > { %v1641_v23 = vmul.f32 1.442695, %v1634_v22 }
 0x27c   : > { %2893 = vpow2.f32 %v1641_v23 }
 0x27d   : > { %v2888_v24 = vpop.eup %2887 }
 0x27e   : > { %v1643_v25 = vsel %vm1430_vm3, %v2888_v24, 0.0 }
 0x27f   : > { %1644 = vadd.xlane.f32.xlu0 %v1643_v25 }
 0x281   : > { %v2890_v26 = vpop.eup %2889 }
 0x282   : > { %v1646_v27 = vsel %vm1430_vm3, %v2890_v26, 0.0 }
 0x283   : > { %1647 = vadd.xlane.f32.xlu1 %v1646_v27 }
 0x285   : > { %v2892_v28 = vpop.eup %2891 }
 0x286   : > { %v1649_v29 = vsel %vm1430_vm3, %v2892_v28, 0.0 }
 0x287   : > { %1650 = vadd.xlane.f32.xlu0 %v1649_v29 }
 0x289   : > { %v2894_v30 = vpop.eup %2893 }
 0x28a   : > { %v1652_v31 = vsel %vm1430_vm3, %v2894_v30, 0.0 }
 0x28b   : > { %1653 = vadd.xlane.f32.xlu1 %v1652_v31 }
 0x308   : > { %v1645_v32 = vpop.xlane.xlu0 %1644 }
 0x309   : > { %2895 = vrcp.f32 %v1645_v32 }
 0x30c   : > { %v1648_v33 = vpop.xlane.xlu1 %1647 }
 0x30d   : > { %2897 = vrcp.f32 %v1648_v33 }
 0x310   : > { %v1651_v35 = vpop.xlane.xlu0 %1650 }
 0x311   : > { %2899 = vrcp.f32 %v1651_v35 }
 0x314   : > { %v1654_v38 = vpop.xlane.xlu1 %1653 }
 0x315   : > { %2901 = vrcp.f32 %v1654_v38 }
 0x316   : > { %v2896_v39 = vpop.eup %2895 }
 0x317   : > { %v1659_v43 = vmul.f32 %v2896_v39, %v2888_v24 }
 0x319   : > { %v1663_v44 = vpack.c.bf16 %v1659_v43, %v1659_v43 }
 0x31a   : > { %v2898_v46 = vpop.eup %2897 }
 0x31b   : > { %2719 = vmatmul.mubr.msk.bf16.vlgmr.msra.gmra.mxu0 %vm1430_vm3, %v1663_v44  ;;  %v1660_v49 = vmul.f32 %v2898_v46, %v2890_v26 }
 0x31c   : > { %2729 = vmatpush3.bf16.msra.mxu0 %v1768_v47  ;;  %2730 = vmatprep.mubr.msk.bf16.mxu0 %vm3004_vm1, %v3003_v2 }
 0x31d   : > { %v1664_v40 = vpack.c.bf16 %v1660_v49, %v1660_v49  ;;  %2740 = vmatprep.subr.bf16.mxu0 %v3003_v2 }
 0x31e   : > { %v2900_v50 = vpop.eup %2899 }
 0x31f   : > { %2725 = vmatmul.mubr.msk.bf16.vlgmr.msra.gmra.mxu1 %vm1430_vm3, %v1664_v40  ;;  %v1661_v52 = vmul.f32 %v2900_v50, %v2892_v28 }
 0x320   : > { %2735 = vmatpush3.bf16.msra.mxu1 %v1814_v51  ;;  %2736 = vmatprep.mubr.msk.bf16.mxu1 %vm3004_vm1, %v3003_v2 }
 0x321   : > { %v1665_v53 = vpack.c.bf16 %v1661_v52, %v1661_v52  ;;  %2746 = vmatprep.subr.bf16.mxu1 %v3003_v2 }
 0x322   : > { %v2902_v55 = vpop.eup %2901 }
 0x323   : > { %2731 = vmatmul.mubr.msk.bf16.vlgmr.msra.gmra.mxu0 %vm1430_vm3, %v1665_v53  ;;  %v1662_v56 = vmul.f32 %v2902_v55, %v2894_v30  ;;  %v2882_v55 = vld [vmem:[%s3183_s17] sm:$0xff]  }
 0x324   : > { %2741 = vmatpush3.bf16.msra.mxu0 %v1868_v54  ;;  %2742 = vmatprep.mubr.msk.bf16.mxu0 %vm3004_vm1, %v3003_v2  ;;  %v2881_v54 = vld [vmem:[%s3183_s17 + $0x8] sm:$0xff]  }
 0x325   : > { %v1666_v57 = vpack.c.bf16 %v1662_v56, %v1662_v56  ;;  %2752 = vmatprep.subr.bf16.mxu0 %v3003_v2 }
 0x327   : > { %2737 = vmatmul.mubr.msk.bf16.vlgmr.msra.gmra.mxu1 %vm1430_vm3, %v1666_v57 }
 0x328   : > { %2748 = vmatprep.mubr.msk.bf16.mxu1 %vm3004_vm1, %v3003_v2  ;;  %2747 = vmatpush3.bf16.msra.mxu1 %v1914_v59  ;;  %v2507_v59 = vld [vmem:[%s3653_s10] ss:$0 sm:$0xff] }
 0x329   : > { %2758 = vmatprep.subr.bf16.mxu1 %v3003_v2 }
 0x3db   : > { %v1712_v61 = vpop.f32.mrf.mxu0 }
 0x3dc   : > { %v1856_v62 = vpack.c.bf16 %v1712_v61, %v1712_v61  ;;  %v2508_v61 = vld [vmem:[%s3654_s1] ss:$0 sm:$0xff] }
 0x3dd   : > { %v2720_v0 = vpop.f32.mrf.mxu0 }
 0x3de   : > { %2743 = vmatmul.mubr.msk.bf16.vlgmr.msra.gmra.mxu0 %vm1430_vm3, %v1856_v62 }
 0x3df   : > { %v1715_v3 = vpop.f32.mrf.mxu0  ;;  %v1758_v4 = vpop.f32.mrf.mxu1  ;;  %2753 = vmatpush3.bf16.msra.mxu0 %v1960_v63  ;;  %2754 = vmatprep.mubr.msk.bf16.mxu0 %vm3004_vm1, %v3003_v2 }
 0x3e0   : > { %v1857_v5 = vpack.c.bf16 %v1758_v4, %v1758_v4  ;;  %2764 = vmatprep.subr.bf16.mxu0 %v3003_v2  ;;  %v2884_v3 = vld [vmem:[%s3197_s0 + $0x10] sm:$0xff]   ;;  %v2885_v4 = vld [vmem:[%s3197_s0 + $0x8] sm:$0xff]  }
 0x3e1   : > { %v2721_v8 = vpop.f32.mrf.mxu0  ;;  %v2726_v9 = vpop.f32.mrf.mxu1 }
 0x3e2   : > { %2749 = vmatmul.mubr.msk.bf16.vlgmr.msra.gmra.mxu1 %vm1430_vm3, %v1857_v5  ;;  %v2886_v5 = vld [vmem:[%s3197_s0] sm:$0xff]  }
 0x3e3   : > { %v1761_v10 = vpop.f32.mrf.mxu1  ;;  %v1804_v11 = vpop.f32.mrf.mxu0  ;;  %2759 = vmatpush3.bf16.msra.mxu1 %v2006_v7  ;;  %2760 = vmatprep.mubr.msk.bf16.mxu1 %vm3004_vm1, %v3003_v2  ;;  %v2509_v7 = vld [vmem:[%s637_s28] ss:$0 sm:$0xff] }
 0x3e4   : > { %v1858_v12 = vpack.c.bf16 %v1804_v11, %v1804_v11  ;;  %2772 = vmatprep.subr.bf16.mxu1 %v3003_v2 }
 0x3e5   : > { %v2727_v13 = vpop.f32.mrf.mxu1  ;;  %v2732_v14 = vpop.f32.mrf.mxu0 }
 0x3e6   : > { %2755 = vmatmul.mubr.msk.bf16.vlgmr.msra.gmra.mxu0 %vm1430_vm3, %v1858_v12 }
 0x3e7   : > { %v1807_v15 = vpop.f32.mrf.mxu0  ;;  %v1850_v16 = vpop.f32.mrf.mxu1  ;;  %2768 = vmatprep.mubr.msk.bf16.mxu0 %vm3004_vm1, %v3003_v2  ;;  %2765 = vmatpush3.bf16.msra.mxu0 %v2881_v54 }
 0x3e8   : > { %v1859_v17 = vpack.c.bf16 %v1850_v16, %v1850_v16  ;;  %2766 = vmatprep.subr.bf16.mxu0 %v3003_v2 }
 0x3e9   : > { %v2733_v18 = vpop.f32.mrf.mxu0  ;;  %v2738_v19 = vpop.f32.mrf.mxu1 }
 0x3ea   : > { %2761 = vmatmul.mubr.msk.bf16.vlgmr.msra.gmra.mxu1 %vm1430_vm3, %v1859_v17 }
 0x3eb   : > { %v1853_v20 = vpop.f32.mrf.mxu1  ;;  %2780 = vmatprep.mubr.msk.bf16.mxu1 %vm3004_vm1, %v3003_v2  ;;  %2767 = vmatpush3.bf16.msra.mxu0 %v2882_v55 }
 0x3ec   : > { %2773 = vmatpush3.bf16.msra.mxu1 %v2883_v1 }
 0x3ed   : > { %v2739_v21 = vpop.f32.mrf.mxu1  ;;  %2774 = vmatprep.subr.bf16.mxu1 %v3003_v2 }
 0x3f0   : > { %2775 = vmatpush3.bf16.msra.mxu1 %v2884_v3 }
 0x3f1   : > { %2776 = vmatprep.subr.bf16.mxu1 %v3003_v2 }
 0x3f4   : > { %2777 = vmatpush3.bf16.msra.mxu1 %v2885_v4 }
 0x3f5   : > { %2778 = vmatprep.subr.bf16.mxu1 %v3003_v2 }
 0x3f8   : > { %2779 = vmatpush3.bf16.msra.mxu1 %v2886_v5 }
 0x49e   : > { %v1904_v22 = vpop.f32.mrf.mxu0 }
 0x49f   : > { %v2048_v31 = vsel %vm718_vm2, %v1904_v22, 0.0  ;;  %v2513_v22 = vld [vmem:[%s645_s7] ss:$0 sm:$0xff] }
 0x4a0   : > { %v2744_v23 = vpop.f32.mrf.mxu0 }
 0x4a2   : > { %v1907_v24 = vpop.f32.mrf.mxu0  ;;  %v1950_v25 = vpop.f32.mrf.mxu1 }
 0x4a3   : > { %v2049_v28 = vsel %vm718_vm2, %v1950_v25, 0.0 }
 0x4a4   : > { %v2745_v26 = vpop.f32.mrf.mxu0  ;;  %v2750_v27 = vpop.f32.mrf.mxu1  ;;  %v2050_v33 = vadd.f32 %v2049_v28, %v2048_v31 }
 0x4a6   : > { %v1953_v29 = vpop.f32.mrf.mxu1  ;;  %v1996_v30 = vpop.f32.mrf.mxu0 }
 0x4a7   : > { %v2051_v32 = vsel %vm718_vm2, %v1996_v30, 0.0 }
 0x4a8   : > { %v2751_v34 = vpop.f32.mrf.mxu1  ;;  %v2756_v35 = vpop.f32.mrf.mxu0  ;;  %v2052_v36 = vadd.f32 %v2051_v32, %v2050_v33 }
 0x4aa   : > { %v1999_v37 = vpop.f32.mrf.mxu0  ;;  %v2042_v38 = vpop.f32.mrf.mxu1 }
 0x4ab   : > { %v2053_v39 = vsel %vm718_vm2, %v2042_v38, 0.0 }
 0x4ac   : > { %v2054_v42 = vadd.f32 %v2053_v39, %v2052_v36  ;;  %v2757_v43 = vpop.f32.mrf.mxu0  ;;  %v2762_v44 = vpop.f32.mrf.mxu1  ;;  %v2519_v39 = vld [vmem:[%s648_s30] ss:$0 sm:$0xff] }
 0x4ae   : > { %v2062_v46 = vadd.f32 %v2506_v41, %v2054_v42  ;;  %v2045_v47 = vpop.f32.mrf.mxu1  ;;  %v2520_v42 = vld [vmem:[%s651_s18] ss:$0 sm:$0xff] }
 0x4b0   : > { %v2763_v48 = vpop.f32.mrf.mxu1  ;;  %v2063_v49 = vadd.f32 %v2062_v46, %v3229_v6 }
 0x4b2   : > { %v2064_v40 = vsel %vm718_vm2, %v2063_v49, 0.0 }
 0x4b3   : > { %2065 = vadd.xlane.f32.xlu0 %v2064_v40 }
 0x53c   : > { %v2066_v50 = vpop.xlane.xlu0 %2065 }
 0x53d   : > { %v2068_v45 = vmul.f32 0.03125, %v2066_v50 }
 0x53f   : > { %v2069_v51 = vsub.f32 %v2063_v49, %v2068_v45 }
 0x541   : > { %v2070_v52 = vmul.f32 %v2069_v51, %v2069_v51 }
 0x543   : > { %v2071_v53 = vsel %vm718_vm2, %v2070_v52, 0.0 }
 0x544   : > { %2072 = vadd.xlane.f32.xlu1 %v2071_v53 }
 0x5cd   : > { %v2073_v56 = vpop.xlane.xlu1 %2072 }
 0x5ce   : > { %v2074_v6 = vmul.f32 0.03125, %v2073_v56 }
 0x5d0   : > { %v2075_v57 = vadd.f32 1e-12, %v2074_v6 }
 0x5d2   : > { %2903 = vrsqrt.f32 %v2075_v57 }
 0x5df   : > { %v2904_v58 = vpop.eup %2903 }
 0x5e0   : > { %v2077_v60 = vmul.f32 %v2904_v58, %v2069_v51 }
 0x5e2   : > { %v2085_v62 = vmul.f32 %v2507_v59, %v2077_v60 }
 0x5e4   : > { %v2093_v63 = vadd.f32 %v2508_v61, %v2085_v62 }
 0x5e6   : > { %v2094_v0 = vpack.c.bf16 %v2093_v63, %v2093_v63 }
 0x5e8   : > { %2769 = vmatmul.mubr.msk.bf16.vlgmr.msra.gmra.mxu0 %vm718_vm2, %v2094_v0 }
 0x6a8   : > { %v2155_v8 = vpop.f32.mrf.mxu0 }
 0x6a9   : > { %v2156_v9 = vadd.f32 %v2509_v7, %v2155_v8 }
 0x6aa   : > { %v2770_v10 = vpop.f32.mrf.mxu0 }
 0x6ab   : > { %v2162_v11 = vmul.f32 0.044715, %v2156_v9  ;;  %v2161_v2 = vmul.f32 0.5, %v2156_v9 }
 0x6ac   : > { %v2158_v12 = vpop.f32.mrf.mxu0 }
 0x6ad   : > { %v2163_v13 = vmul.f32 %v2162_v11, %v2156_v9 }
 0x6ae   : > { %v2771_v14 = vpop.f32.mrf.mxu0 }
 0x6af   : > { %v2164_v15 = vmul.f32 %v2163_v13, %v2156_v9 }
 0x6b1   : > { %v2165_v16 = vadd.f32 %v2164_v15, %v2156_v9 }
 0x6b3   : > { %v2166_v17 = vmul.f32 0.7978846, %v2165_v16 }
 0x6b5   : > { %2905 = vtanh.f32 %v2166_v17 }
 0x6c2   : > { %v2906_v18 = vpop.eup %2905 }
 0x6c3   : > { %v2168_v19 = vadd.f32 1.0, %v2906_v18 }
 0x6c5   : > { %v2169_v20 = vmul.f32 %v2168_v19, %v2161_v2 }
 0x6c7   : > { %v2170_v21 = vpack.c.bf16 %v2169_v20, %v2169_v20 }
 0x6c9   : > { %2781 = vmatmul.mubr.msk.bf16.vlgmr.msra.gmra.mxu1 %vm2210_vm5, %v2170_v21 }
 0x789   : > { %v2248_v23 = vpop.f32.mrf.mxu1 }
 0x78a   : > { %v2249_v24 = vadd.f32 %v2513_v22, %v2248_v23 }
 0x78b   : > { %v2782_v25 = vpop.f32.mrf.mxu1 }
 0x78c   : > { %v2254_v26 = vadd.f32 %v2249_v24, %v2093_v63 }
 0x78d   : > { %v2251_v27 = vpop.f32.mrf.mxu1 }
 0x78e   : > { %v2255_v28 = vsel %vm718_vm2, %v2254_v26, 0.0 }
 0x78f   : > { %2256 = vadd.xlane.f32.xlu0 %v2255_v28  ;;  %v2783_v29 = vpop.f32.mrf.mxu1 }
 0x818   : > { %v2257_v30 = vpop.xlane.xlu0 %2256 }
 0x819   : > { %v2258_v31 = vmul.f32 0.03125, %v2257_v30 }
 0x81b   : > { %v2259_v32 = vsub.f32 %v2254_v26, %v2258_v31 }
 0x81d   : > { %v2260_v33 = vmul.f32 %v2259_v32, %v2259_v32 }
 0x81f   : > { %v2261_v34 = vsel %vm718_vm2, %v2260_v33, 0.0 }
 0x820   : > { %2262 = vadd.xlane.f32.xlu1 %v2261_v34 }
 0x8a9   : > { %v2263_v35 = vpop.xlane.xlu1 %2262 }
 0x8aa   : > { %v2264_v36 = vmul.f32 0.03125, %v2263_v35 }
 0x8ac   : > { %v2265_v37 = vadd.f32 1e-12, %v2264_v36 }
 0x8ae   : > { %2907 = vrsqrt.f32 %v2265_v37 }
 0x8bb   : > { %v2908_v38 = vpop.eup %2907 }
 0x8bc   : > { %v2267_v41 = vmul.f32 %v2908_v38, %v2259_v32 }
 0x8be   : > { %v2275_v43 = vmul.f32 %v2519_v39, %v2267_v41  ;;  %2288 = sbr.rel (%p2521_p1) target bundleno = 2244 (0x8c4), region = 96 }
 0x8c0   : > { %v2283_v44 = vadd.f32 %v2520_v42, %v2275_v43 }
 0x8c2   : > { %2284 = vst.msk [vmem:[#allocation2] sm:$0xff] %vm718_vm2, %v2283_v44 }
 0x8c3   : > { %2289 = vst.msk [vmem:[%s625_s25] sm:$0xff] %vm718_vm2, %v2283_v44 }
 0x8c4 PF: > { %s3655_s10 = sld [smem:[#allocation9_spill]]  ;;  %s2304_s26 = sshll.u32 %s625_s25, 4  ;;  %s2305_s26 = int_to_ptr.vmem [resolvable:$true] %s2304_s26 }
 0x8c5   : > { %s3656_s30 = sld [smem:[#allocation7_spill]]  ;;  %s2909_s0 = scalar_lea.vmem %s2305_s26, 128 }
 0x8c6   : > { %s3658_s18 = sld [smem:[#allocation25_spill]]  ;;  %p2910_p2 = scmp.ne.s32.totalorder %s2305_s26, %s2909_s0 }
 0x8c7   : > { %s3005_s7 = smov [#allocation3]  }
 0x8c8   : > { %p2911_p4 = pnand %p2910_p2, %p3145_p3  ;;  %s2913_s24 = sshll.u32 %s3005_s7, 4  ;;  %s2914_s24 = int_to_ptr.vmem [resolvable:$false] %s2913_s24 }
 0x8c9   : > { %s2915_s8 = scalar_lea.vmem %s2914_s24, 256  ;;  %p2916_p6 = scmp.lt.s32.totalorder %s2305_s26, %s2914_s24 }
 0x8ca   : > { %s2523_s22 = sshll.u32 %s3655_s10, 7  ;;  %p2912_p5 = pneg %p2911_p4 }
 0x8cb   : > { %s3659_s28 = sand.u32 1, %s3656_s30   ;;  %p2917_p7 = scmp.lt.s32.totalorder %s2915_s8, %s2909_s0 }
 0x8cc   : > { %s2302_s17 = scalar_lea.hbm %s3658_s18, %s2523_s22  ;;  %s2291_s27 = scalar_lea.sflag [#allocation4], %s3659_s28 }
 0x8cd   : > { %p2918_p8 = por %p2917_p7, %p2916_p6 }
 0x8cf   : > { %p2919_p10 = pnand %p2918_p8, %p2912_p5 }
 0x8d1   : > { %2922 = shalt.err (!%p2919_p10)
}
 0x8d2   : > { %s2923_s6 = scalar_lea.hbm %s2302_s17, 128  ;;  %s2927_s10 = scalar_lea.hbm %s3658_s18, 256 }
 0x8d3   : > { %p2924_p11 = scmp.ne.s32.totalorder %s2302_s17, %s2923_s6  ;;  %p2928_p0 = scmp.lt.s32.totalorder %s2302_s17, %s3658_s18 }
 0x8d4   : > { %p2929_p1 = scmp.lt.s32.totalorder %s2927_s10, %s2923_s6 }
 0x8d5   : > { %p2925_p12 = pnand %p2924_p11, %p3145_p3 }
 0x8d6   : > { %p2930_p2 = por %p2929_p1, %p2928_p0 }
 0x8d7   : > { %p2926_p13 = pneg %p2925_p12 }
 0x8d9   : > { %p2931_p4 = pnand %p2930_p2, %p2926_p13 }
 0x8db   : > { %2934 = shalt.err (!%p2931_p4)
}
 0x8dc   : > { %2784 = dma.vmem_to_hbm [thread:$0]  (%p3145_p3), %s2305_s26, 128, %s2302_s17, %s2291_s27  }
 0x8dd PF: > { %s3660_s1 = sld [smem:[#allocation12_spill]] }
 0x8de   : > { %s3661_s20 = sld [smem:[#allocation6_spill]] }
 0x8e3   : > { %p2790_p5 = scmp.ge.s32.totalorder %s3660_s1, 2 }
 0x8e4   : > { %s2316_s0 = sand.u32 1, %s3661_s20  }
 0x8e5   : > { %p2787_p6 = pnand %p2790_p5, %p3155_p9  ;;  %s2317_s7 = scalar_lea.sflag [#allocation4], %s2316_s0 }
 0x8e7   : > { %p2788_p7 = pneg %p2787_p6 }
 0x8e9   : > { %2968 = dma.done.wait (%p2788_p7), %s2317_s7, 128  }
 0x8ea   : > { %2970 = vsyncadd (%p2788_p7), %s2317_s7, 4294967168  ;;  %s30_s30 = sadd.s32 1, %s3660_s1   ;;  %s3663_s24 = sld [smem:[#allocation7_spill]] }
 0x8eb   : > { %p27_p8 = scmp.ge.s32.totalorder %s30_s30, 6   ;;  %s3664_s25 = sld [smem:[#allocation8_spill]] }
 0x8ec   : > { %s3665_s26 = sld [smem:[#allocation17_spill]] }
 0x8ed   : > { %s3666_s27 = sld [smem:[#allocation10_spill]]  ;;  %29 = sbr.rel (!%p27_p8) target bundleno = 14 (0xe), region = 149 }
 0x8ee   : > { %s3667_s28 = sld [smem:[#allocation11_spill]] }
 0x8ef   : > { %s3668_s29 = sld [smem:[#allocation13_spill]] }
 0x8f0   : > { %s3669_s0 = sld [smem:[#allocation15_spill]] }
 0x8f2   :  { %2322 = vsyncpa [#allocation4], 1 }
 0x8f3   :  { %2324 = vsyncpa [#allocation4 + $0x1], 1 }

</bundles_post_ra>
